<compile_context>
chip_gen: v6e
topology: v6e:2x2x1
jax: 0.10.0
libtpu: 0.0.40
codegen_flags: <defaults>
</compile_context>

<pallas_src>
import functools

import jax
import jax.numpy as jnp
from jax import lax
from jax.experimental import pallas as pl
from jax.experimental.pallas import tpu as pltpu

BN_EPS = 1e-5
LANES = 128


def _round_up(x, m):
    return ((x + m - 1) // m) * m


def _pick_tile_rows(N, H, W, Cp, max_tile_bytes=4 << 20):
    """Largest row tile TH that divides H, keeps TH*W sublane-aligned, stays under a
    modest per-tile VMEM budget, and (when possible) yields >= 8 grid steps."""
    best = None
    for th in range(H, 0, -1):
        if H % th or (th * W) % 8:
            continue
        if best is None:
            best = th
        if th * W * Cp * 2 > max_tile_bytes:      # bf16 center tile budget
            continue
        best = th
        if N * (H // th) >= 8:                    # enough steps to pipeline
            break
    return best if best is not None else H


def _vmem_limit_bytes():
    """Generation-aware scoped-VMEM limit (~75% of physical, clamped)."""
    limit = 32 * 1024 * 1024                      # safe floor on every generation
    try:
        cap = int(pltpu.get_tpu_info().vmem_capacity_bytes)
        limit = int(min(max(cap * 3 // 4, limit), 100 * 1024 * 1024))
    except Exception:
        pass                                       # keep the safe floor
    return limit


# ----------------------------------------------------------------------------
# In-kernel helpers
# ----------------------------------------------------------------------------
def _conv3x3_acc(ext, w_ref, *, TH, W, Cp):
    """3x3 SAME conv of one haloed row tile as 9 accumulated MXU matmuls.

    ext:   ((TH+2)*W, Cp) bf16 — the row tile with a 1-row halo above/below; the
           halo rows are already zeroed at the image border by the caller.
    w_ref: (9, Cp, Cp) bf16 ref, tap-major (ky, kx) ordering, [cin, cout] slabs.
    Returns the (TH*W, Cp) float32 accumulator.
    """
    THW = TH * W
    EXT = (TH + 2) * W

    # Column-validity masks, hoisted out of the tap loop.  Only dx != 0 needs one;
    # the vertical taps are fully covered by the (zeroed-at-border) halo rows.
    col = lax.broadcasted_iota(jnp.int32, (EXT, 1), 0) % W
    zeros = jnp.zeros_like(ext)
    left_src = jnp.where(col != W - 1, ext, zeros)    # feeds every dx = -1 tap
    right_src = jnp.where(col != 0, ext, zeros)       # feeds every dx = +1 tap

    # One single-row shift per lateral direction (2 shifted temporaries total,
    # instead of one misaligned copy per tap).
    zrow = jnp.zeros((1, Cp), ext.dtype)
    shifted = {
        -1: jnp.concatenate([zrow, left_src[:EXT - 1]], axis=0),   # [i] = ext[i-1]
        0: ext,
        1: jnp.concatenate([right_src[1:], zrow], axis=0),         # [i] = ext[i+1]
    }

    acc = jnp.zeros((THW, Cp), jnp.float32)
    k = 0
    for dy in (-1, 0, 1):
        base = (1 + dy) * W                       # sublane-aligned (W % 8 == 0)
        for dx in (-1, 0, 1):
            tap = shifted[dx][base:base + THW]    # aligned prefix/suffix slice
            acc = acc + jnp.dot(tap, w_ref[k],
                                preferred_element_type=jnp.float32)
            k += 1
    return acc


def _masked_halos(top, bot, t, n_t):
    """Zero the fetched halo rows when they fall outside the image."""
    top = jnp.where(t > 0, top, jnp.zeros_like(top))
    bot = jnp.where(t < n_t - 1, bot, jnp.zeros_like(bot))
    return top, bot


def _store_conv_and_stats(acc, y_ref, stats_ref):
    """Store conv output and its per-tile BN partials (sum, sum-of-squares)."""
    y_ref[0] = acc.astype(y_ref.dtype)
    s = jnp.sum(acc, axis=0, keepdims=True)            # (1, Cp)
    ss = jnp.sum(acc * acc, axis=0, keepdims=True)     # (1, Cp)
    stats_ref[0, 0] = jnp.concatenate([s, ss], axis=0)  # (2, Cp)


# ----------------------------------------------------------------------------
# Kernels (one (batch, row-tile) block per grid step)
# ----------------------------------------------------------------------------
def conv1_kernel(top_ref, x_ref, bot_ref, w_ref, y_ref, stats_ref, *, TH, W, Cp):
    t = pl.program_id(1)
    top, bot = _masked_halos(top_ref[0], bot_ref[0], t, pl.num_programs(1))
    ext = jnp.concatenate([top, x_ref[0], bot], axis=0)
    acc = _conv3x3_acc(ext, w_ref, TH=TH, W=W, Cp=Cp)
    _store_conv_and_stats(acc, y_ref, stats_ref)


def bn_relu_conv_kernel(scale_ref, shift_ref, top_ref, x_ref, bot_ref, w_ref,
                        y_ref, stats_ref, *, TH, W, Cp):
    t = pl.program_id(1)

    def bn_relu(v):                                   # folded BN1 + ReLU (f32 math)
        a = v.astype(jnp.float32) * scale_ref[...] + shift_ref[...]
        return jnp.maximum(a, 0.0).astype(jnp.bfloat16)

    # Apply BN/ReLU to the real data first, then zero out-of-image halo rows.
    top, bot = _masked_halos(bn_relu(top_ref[0]), bn_relu(bot_ref[0]),
                             t, pl.num_programs(1))
    ext = jnp.concatenate([top, bn_relu(x_ref[0]), bot], axis=0)
    acc = _conv3x3_acc(ext, w_ref, TH=TH, W=W, Cp=Cp)
    _store_conv_and_stats(acc, y_ref, stats_ref)


# ----------------------------------------------------------------------------
# Wrapper
# ----------------------------------------------------------------------------
def basic_residual_block(x_nchw, w1, w2, g1, b1, g2, b2):
    """Forward pass. x_nchw: (N, C, H, W) float32. Returns (N, C, H, W) float32."""
    N, C, H, W = x_nchw.shape
    if not (w1.shape == (3, 3, C, C) and w2.shape == (3, 3, C, C)):
        raise ValueError("downsample=None residual path requires Cin == Cout == C")
    if W % 8 != 0:
        # TODO(synk): pad W to a multiple of 8 in the wrapper for odd widths.
        raise NotImplementedError("W must be a multiple of 8 for this kernel")

    Cp = _round_up(C, LANES)                 # lane-dense channel padding
    TH = _pick_tile_rows(N, H, W, Cp)        # row-tile height
    nH = H // TH
    HW = H * W
    THW = TH * W

    # ---- wrapper-side layout plumbing (kept out of the kernels) ----
    x_nhwc = jnp.transpose(x_nchw, (0, 2, 3, 1)).astype(jnp.float32)
    x_pad = jnp.pad(x_nhwc, ((0, 0), (0, 0), (0, 0), (0, Cp - C)))
    x_flat = x_pad.reshape(N, HW, Cp).astype(jnp.bfloat16)      # MXU input

    def pack_weight(w):                      # HWIO (3,3,C,C) -> (9, Cp, Cp) bf16
        wp = jnp.pad(w.astype(jnp.float32),
                     ((0, 0), (0, 0), (0, Cp - C), (0, Cp - C)))
        return wp.reshape(9, Cp, Cp).astype(jnp.bfloat16)

    w1p, w2p = pack_weight(w1), pack_weight(w2)

    def pad_vec(v):                          # gamma/beta; padded lanes stay zero
        return jnp.pad(v.astype(jnp.float32), (0, Cp - C))

    g1p, b1p, g2p, b2p = pad_vec(g1), pad_vec(b1), pad_vec(g2), pad_vec(b2)

    # ---- BlockSpecs: center tile + clamped 1-row halos above/below ----
    center_spec = pl.BlockSpec((1, THW, Cp), lambda b, t: (b, t, 0))
    top_spec = pl.BlockSpec((1, W, Cp),
                            lambda b, t: (b, jnp.maximum(t * TH - 1, 0), 0))
    bot_spec = pl.BlockSpec((1, W, Cp),
                            lambda b, t: (b, jnp.minimum((t + 1) * TH, H - 1), 0))
    # TODO(synk): pipeline_mode=pl.Buffered(1) here once supported — the weight
    # block index is constant so the default double buffer only wastes VMEM.
    w_spec = pl.BlockSpec((9, Cp, Cp), lambda b, t: (0, 0, 0))
    vec_spec = pl.BlockSpec((1, Cp), lambda b, t: (0, 0))
    stats_spec = pl.BlockSpec((1, 1, 2, Cp), lambda b, t: (b, t, 0, 0))

    cparams = pltpu.CompilerParams(
        dimension_semantics=("parallel", "parallel"),   # (batch, row-tile)
        vmem_limit_bytes=_vmem_limit_bytes())

    conv_cost = pl.CostEstimate(
        flops=2 * N * HW * 9 * Cp * Cp,
        transcendentals=0,
        bytes_accessed=(2 * N * HW * Cp * 2            # center in + out (bf16)
                        + 2 * N * nH * W * Cp * 2      # halo re-reads
                        + 9 * Cp * Cp * 2              # weights
                        + N * nH * 2 * Cp * 4))        # stats partials

    act_shape = jax.ShapeDtypeStruct((N, HW, Cp), jnp.bfloat16)
    stats_shape = jax.ShapeDtypeStruct((N, nH, 2, Cp), jnp.float32)

    # ---- pass 1: conv1 + per-tile BN1 partial stats ----
    y1, st1 = pl.pallas_call(
        functools.partial(conv1_kernel, TH=TH, W=W, Cp=Cp),
        out_shape=(act_shape, stats_shape),
        grid=(N, nH),
        in_specs=[top_spec, center_spec, bot_spec, w_spec],
        out_specs=(center_spec, stats_spec),
        compiler_params=cparams,
        cost_estimate=conv_cost,
    )(x_flat, x_flat, x_flat, w1p)

    # Training-mode BN: statistics are global over the batch.  Reduce the tiny
    # per-tile partials here and fold gamma/beta into one scale/shift pair.
    # (Kept in the wrapper on purpose — an in-kernel cross-grid accumulator would
    # serialize the grid and kill megacore sharding.)
    def fold_bn(stats, gamma, beta):
        count = float(N * HW)
        mean = jnp.sum(stats[:, :, 0, :], axis=(0, 1)) / count
        var = jnp.sum(stats[:, :, 1, :], axis=(0, 1)) / count - mean * mean
        inv = lax.rsqrt(var + BN_EPS)                  # biased variance, eps=1e-5
        scale = gamma * inv
        shift = beta - mean * scale
        return scale, shift

    scale1, shift1 = fold_bn(st1, g1p, b1p)

    # ---- pass 2: bn1 + relu + conv2 + per-tile BN2 partial stats ----
    y2, st2 = pl.pallas_call(
        functools.partial(bn_relu_conv_kernel, TH=TH, W=W, Cp=Cp),
        out_shape=(act_shape, stats_shape),
        grid=(N, nH),
        in_specs=[vec_spec, vec_spec, top_spec, center_spec, bot_spec, w_spec],
        out_specs=(center_spec, stats_spec),
        compiler_params=cparams,
        cost_estimate=conv_cost,
    )(scale1.reshape(1, Cp), shift1.reshape(1, Cp), y1, y1, y1, w2p)

    scale2, shift2 = fold_bn(st2, g2p, b2p)

    # ---- fused epilogue (plain jnp so XLA fuses it with unpad + NCHW transpose):
    # bn2 + residual add (f32 skip path) + relu, single pass over the data.
    y2_f32 = y2.reshape(N, H, W, Cp)[..., :C].astype(jnp.float32)
    out_nhwc = jnp.maximum(y2_f32 * scale2[:C] + shift2[:C] + x_nhwc, 0.0)
    return jnp.transpose(out_nhwc, (0, 3, 1, 2))       # back to NCHW


# ---------------- pure-JAX f32 reference (for the correctness check) ----------------
def _ref_bn(x_nhwc, g, b):
    mean = jnp.mean(x_nhwc, axis=(0, 1, 2), keepdims=True)
    var = jnp.mean((x_nhwc - mean) ** 2, axis=(0, 1, 2), keepdims=True)
    return (x_nhwc - mean) * lax.rsqrt(var + BN_EPS) * g + b


def reference(x_nchw, w1, w2, g1, b1, g2, b2):
    x = jnp.transpose(x_nchw, (0, 2, 3, 1))

    def conv(inp, w):
        return lax.conv_general_dilated(
            inp, w, window_strides=(1, 1), padding='SAME',
            dimension_numbers=('NHWC', 'HWIO', 'NHWC'))

    y = jnp.maximum(_ref_bn(conv(x, w1), g1.reshape(1, 1, 1, -1),
                            b1.reshape(1, 1, 1, -1)), 0.0)
    z = _ref_bn(conv(y, w2), g2.reshape(1, 1, 1, -1), b2.reshape(1, 1, 1, -1))
    return jnp.transpose(jnp.maximum(z + x, 0.0), (0, 3, 1, 2))


if __name__ == "__main__":
    key = jax.random.PRNGKey(0)
    k1, k2, k3, k4, k5, k6, k7 = jax.random.split(key, 7)

    # inplanes = planes = 4 (residual path needs matching channels), stride = 1
    N, C, H, W = 2, 4, 16, 16
    x = jax.random.normal(k1, (N, C, H, W), jnp.float32)
    w1 = 0.1 * jax.random.normal(k2, (3, 3, C, C), jnp.float32)   # conv1 weight (HWIO)
    w2 = 0.1 * jax.random.normal(k3, (3, 3, C, C), jnp.float32)   # conv2 weight (HWIO)
    g1 = 1.0 + 0.1 * jax.random.normal(k4, (C,), jnp.float32)     # bn1 gamma
    b1 = 0.1 * jax.random.normal(k5, (C,), jnp.float32)           # bn1 beta
    g2 = 1.0 + 0.1 * jax.random.normal(k6, (C,), jnp.float32)     # bn2 gamma
    b2 = 0.1 * jax.random.normal(k7, (C,), jnp.float32)           # bn2 beta

    block = jax.jit(basic_residual_block)
    out = jax.block_until_ready(block(x, w1, w2, g1, b1, g2, b2))

    ref = reference(x, w1, w2, g1, b1, g2, b2)
    # Tolerance sized for bf16 MXU inputs (activations + weights) vs the pure-f32
    # reference; accumulation, BN/ReLU math and the residual path are f32.
    if not jnp.allclose(out, ref, atol=5e-2, rtol=5e-2):
        err = float(jnp.max(jnp.abs(out - ref)))
        raise AssertionError(
            f"Pallas block output mismatch vs JAX reference (max abs err = {err})")

    print("KERNEL_OK")
</pallas_src>

<mosaic_0001>
module attributes {stable_mosaic.version = 11 : i64} {
  func.func @conv1_kernel(%arg0: i32, %arg1: i32, %arg2: memref<1x16x128xbf16, #tpu.memory_space<vmem>>, %arg3: memref<1x64x128xbf16, #tpu.memory_space<vmem>>, %arg4: memref<1x16x128xbf16, #tpu.memory_space<vmem>>, %arg5: memref<9x128x128xbf16, #tpu.memory_space<vmem>>, %arg6: memref<1x64x128xbf16, #tpu.memory_space<vmem>>, %arg7: memref<1x1x2x128xf32, #tpu.memory_space<vmem>>) attributes {dimension_semantics = [#tpu.dimension_semantics<parallel>, #tpu.dimension_semantics<parallel>], iteration_bounds = array<i64: 2, 4>, scalar_prefetch = 0 : i64, scratch_operands = 0 : i64, tpu.core_type = #tpu.core_type<tc>, window_params = [{transform_indices = @transform_0, window_bounds = array<i64: 1, 16, 128>}, {transform_indices = @transform_1, window_bounds = array<i64: 1, 64, 128>}, {transform_indices = @transform_2, window_bounds = array<i64: 1, 16, 128>}, {pipeline_mode = #tpu.pipeline_mode<synchronous>, transform_indices = @transform_3, window_bounds = array<i64: 9, 128, 128>}, {transform_indices = @transform_4, window_bounds = array<i64: 1, 64, 128>}, {transform_indices = @transform_5, window_bounds = array<i64: 1, 1, 2, 128>}]} {
    %c0 = arith.constant 0 : index
    %c0_0 = arith.constant 0 : index
    %c0_1 = arith.constant 0 : index
    %0 = vector.load %arg2[%c0, %c0_0, %c0_1] : memref<1x16x128xbf16, #tpu.memory_space<vmem>>, vector<1x16x128xbf16>
    %1 = vector.shape_cast %0 : vector<1x16x128xbf16> to vector<16x128xbf16>
    %c0_2 = arith.constant 0 : index
    %c0_3 = arith.constant 0 : index
    %c0_4 = arith.constant 0 : index
    %2 = vector.load %arg4[%c0_2, %c0_3, %c0_4] : memref<1x16x128xbf16, #tpu.memory_space<vmem>>, vector<1x16x128xbf16>
    %3 = vector.shape_cast %2 : vector<1x16x128xbf16> to vector<16x128xbf16>
    %c0_i32 = arith.constant 0 : i32
    %4 = arith.cmpi sgt, %arg1, %c0_i32 : i32
    %cst = arith.constant 0.000000e+00 : bf16
    %5 = vector.broadcast %cst : bf16 to vector<16x128xbf16>
    %6 = arith.select %4, %1, %5 : vector<16x128xbf16>
    %c3_i32 = arith.constant 3 : i32
    %7 = arith.cmpi slt, %arg1, %c3_i32 : i32
    %cst_5 = arith.constant 0.000000e+00 : bf16
    %8 = vector.broadcast %cst_5 : bf16 to vector<16x128xbf16>
    %9 = arith.select %7, %3, %8 : vector<16x128xbf16>
    %c0_6 = arith.constant 0 : index
    %c0_7 = arith.constant 0 : index
    %c0_8 = arith.constant 0 : index
    %10 = vector.load %arg3[%c0_6, %c0_7, %c0_8] : memref<1x64x128xbf16, #tpu.memory_space<vmem>>, vector<1x64x128xbf16>
    %11 = vector.shape_cast %10 : vector<1x64x128xbf16> to vector<64x128xbf16>
    %12 = tpu.concatenate %6, %11, %9 in 0 : vector<16x128xbf16>, vector<64x128xbf16>, vector<16x128xbf16> -> vector<96x128xbf16>
    %13 = tpu.iota {dimensions = array<i32: 0>} : vector<96x1xi32>
    %c16_i32 = arith.constant 16 : i32
    %c0_i32_9 = arith.constant 0 : i32
    %14 = arith.cmpi eq, %c16_i32, %c0_i32_9 : i32
    %c1_i32 = arith.constant 1 : i32
    %15 = arith.select %14, %c1_i32, %c16_i32 : i32
    %16 = vector.broadcast %15 : i32 to vector<96x1xi32>
    %17 = arith.remsi %13, %16 : vector<96x1xi32>
    %c0_i32_10 = arith.constant 0 : i32
    %18 = vector.broadcast %c0_i32_10 : i32 to vector<96x1xi32>
    %19 = arith.cmpi ne, %17, %18 : vector<96x1xi32>
    %c0_i32_11 = arith.constant 0 : i32
    %20 = vector.broadcast %c0_i32_11 : i32 to vector<96x1xi32>
    %21 = arith.cmpi slt, %17, %20 : vector<96x1xi32>
    %c0_i32_12 = arith.constant 0 : i32
    %22 = arith.cmpi slt, %15, %c0_i32_12 : i32
    %23 = vector.broadcast %22 : i1 to vector<96x1xi1>
    %24 = vector.broadcast %23 : vector<96x1xi1> to vector<96x1xi1>
    %25 = arith.xori %21, %24 : vector<96x1xi1>
    %26 = arith.andi %25, %19 : vector<96x1xi1>
    %27 = vector.broadcast %15 : i32 to vector<96x1xi32>
    %28 = arith.addi %17, %27 : vector<96x1xi32>
    %29 = arith.select %26, %28, %17 : vector<96x1xi1>, vector<96x1xi32>
    %cst_13 = arith.constant 0.000000e+00 : bf16
    %30 = vector.broadcast %cst_13 : bf16 to vector<96x128xbf16>
    %c15_i32 = arith.constant 15 : i32
    %31 = vector.broadcast %c15_i32 : i32 to vector<96x1xi32>
    %32 = arith.cmpi ne, %29, %31 : vector<96x1xi32>
    %33 = vector.shape_cast %32 : vector<96x1xi1> to vector<96x1xi1>
    %34 = vector.broadcast %33 : vector<96x1xi1> to vector<96x128xi1>
    %35 = arith.select %34, %12, %30 : vector<96x128xi1>, vector<96x128xbf16>
    %c0_i32_14 = arith.constant 0 : i32
    %36 = vector.broadcast %c0_i32_14 : i32 to vector<96x1xi32>
    %37 = arith.cmpi ne, %29, %36 : vector<96x1xi32>
    %38 = vector.shape_cast %37 : vector<96x1xi1> to vector<96x1xi1>
    %39 = vector.broadcast %38 : vector<96x1xi1> to vector<96x128xi1>
    %40 = arith.select %39, %12, %30 : vector<96x128xi1>, vector<96x128xbf16>
    %cst_15 = arith.constant 0.000000e+00 : bf16
    %41 = vector.broadcast %cst_15 : bf16 to vector<1x128xbf16>
    %42 = vector.extract_strided_slice %35 {offsets = [0, 0], sizes = [95, 128], strides = [1, 1]} : vector<96x128xbf16> to vector<95x128xbf16>
    %43 = tpu.concatenate %41, %42 in 0 : vector<1x128xbf16>, vector<95x128xbf16> -> vector<96x128xbf16>
    %44 = vector.extract_strided_slice %40 {offsets = [1, 0], sizes = [95, 128], strides = [1, 1]} : vector<96x128xbf16> to vector<95x128xbf16>
    %45 = tpu.concatenate %44, %41 in 0 : vector<95x128xbf16>, vector<1x128xbf16> -> vector<96x128xbf16>
    %cst_16 = arith.constant 0.000000e+00 : f32
    %46 = vector.broadcast %cst_16 : f32 to vector<64x128xf32>
    %47 = vector.extract_strided_slice %43 {offsets = [0, 0], sizes = [64, 128], strides = [1, 1]} : vector<96x128xbf16> to vector<64x128xbf16>
    %c0_17 = arith.constant 0 : index
    %c0_18 = arith.constant 0 : index
    %c0_19 = arith.constant 0 : index
    %48 = vector.load %arg5[%c0_17, %c0_18, %c0_19] : memref<9x128x128xbf16, #tpu.memory_space<vmem>>, vector<1x128x128xbf16>
    %49 = vector.shape_cast %48 : vector<1x128x128xbf16> to vector<128x128xbf16>
    %cst_20 = arith.constant dense<0.000000e+00> : vector<64x128xf32>
    %50 = tpu.matmul %47, %49, %cst_20 {dimension_numbers = #tpu.dot_dimension_numbers<[1], [0], [0], [1], [0, 0, 1, 1], [], []>} : vector<64x128xbf16>, vector<128x128xbf16>, vector<64x128xf32> -> vector<64x128xf32>
    %51 = arith.addf %46, %50 : vector<64x128xf32>
    %52 = vector.extract_strided_slice %12 {offsets = [0, 0], sizes = [64, 128], strides = [1, 1]} : vector<96x128xbf16> to vector<64x128xbf16>
    %c1 = arith.constant 1 : index
    %c0_21 = arith.constant 0 : index
    %c0_22 = arith.constant 0 : index
    %53 = vector.load %arg5[%c1, %c0_21, %c0_22] : memref<9x128x128xbf16, #tpu.memory_space<vmem>>, vector<1x128x128xbf16>
    %54 = vector.shape_cast %53 : vector<1x128x128xbf16> to vector<128x128xbf16>
    %cst_23 = arith.constant dense<0.000000e+00> : vector<64x128xf32>
    %55 = tpu.matmul %52, %54, %cst_23 {dimension_numbers = #tpu.dot_dimension_numbers<[1], [0], [0], [1], [0, 0, 1, 1], [], []>} : vector<64x128xbf16>, vector<128x128xbf16>, vector<64x128xf32> -> vector<64x128xf32>
    %56 = arith.addf %51, %55 : vector<64x128xf32>
    %57 = vector.extract_strided_slice %45 {offsets = [0, 0], sizes = [64, 128], strides = [1, 1]} : vector<96x128xbf16> to vector<64x128xbf16>
    %c2 = arith.constant 2 : index
    %c0_24 = arith.constant 0 : index
    %c0_25 = arith.constant 0 : index
    %58 = vector.load %arg5[%c2, %c0_24, %c0_25] : memref<9x128x128xbf16, #tpu.memory_space<vmem>>, vector<1x128x128xbf16>
    %59 = vector.shape_cast %58 : vector<1x128x128xbf16> to vector<128x128xbf16>
    %cst_26 = arith.constant dense<0.000000e+00> : vector<64x128xf32>
    %60 = tpu.matmul %57, %59, %cst_26 {dimension_numbers = #tpu.dot_dimension_numbers<[1], [0], [0], [1], [0, 0, 1, 1], [], []>} : vector<64x128xbf16>, vector<128x128xbf16>, vector<64x128xf32> -> vector<64x128xf32>
    %61 = arith.addf %56, %60 : vector<64x128xf32>
    %62 = vector.extract_strided_slice %43 {offsets = [16, 0], sizes = [64, 128], strides = [1, 1]} : vector<96x128xbf16> to vector<64x128xbf16>
    %c3 = arith.constant 3 : index
    %c0_27 = arith.constant 0 : index
    %c0_28 = arith.constant 0 : index
    %63 = vector.load %arg5[%c3, %c0_27, %c0_28] : memref<9x128x128xbf16, #tpu.memory_space<vmem>>, vector<1x128x128xbf16>
    %64 = vector.shape_cast %63 : vector<1x128x128xbf16> to vector<128x128xbf16>
    %cst_29 = arith.constant dense<0.000000e+00> : vector<64x128xf32>
    %65 = tpu.matmul %62, %64, %cst_29 {dimension_numbers = #tpu.dot_dimension_numbers<[1], [0], [0], [1], [0, 0, 1, 1], [], []>} : vector<64x128xbf16>, vector<128x128xbf16>, vector<64x128xf32> -> vector<64x128xf32>
    %66 = arith.addf %61, %65 : vector<64x128xf32>
    %67 = vector.extract_strided_slice %12 {offsets = [16, 0], sizes = [64, 128], strides = [1, 1]} : vector<96x128xbf16> to vector<64x128xbf16>
    %c4 = arith.constant 4 : index
    %c0_30 = arith.constant 0 : index
    %c0_31 = arith.constant 0 : index
    %68 = vector.load %arg5[%c4, %c0_30, %c0_31] : memref<9x128x128xbf16, #tpu.memory_space<vmem>>, vector<1x128x128xbf16>
    %69 = vector.shape_cast %68 : vector<1x128x128xbf16> to vector<128x128xbf16>
    %cst_32 = arith.constant dense<0.000000e+00> : vector<64x128xf32>
    %70 = tpu.matmul %67, %69, %cst_32 {dimension_numbers = #tpu.dot_dimension_numbers<[1], [0], [0], [1], [0, 0, 1, 1], [], []>} : vector<64x128xbf16>, vector<128x128xbf16>, vector<64x128xf32> -> vector<64x128xf32>
    %71 = arith.addf %66, %70 : vector<64x128xf32>
    %72 = vector.extract_strided_slice %45 {offsets = [16, 0], sizes = [64, 128], strides = [1, 1]} : vector<96x128xbf16> to vector<64x128xbf16>
    %c5 = arith.constant 5 : index
    %c0_33 = arith.constant 0 : index
    %c0_34 = arith.constant 0 : index
    %73 = vector.load %arg5[%c5, %c0_33, %c0_34] : memref<9x128x128xbf16, #tpu.memory_space<vmem>>, vector<1x128x128xbf16>
    %74 = vector.shape_cast %73 : vector<1x128x128xbf16> to vector<128x128xbf16>
    %cst_35 = arith.constant dense<0.000000e+00> : vector<64x128xf32>
    %75 = tpu.matmul %72, %74, %cst_35 {dimension_numbers = #tpu.dot_dimension_numbers<[1], [0], [0], [1], [0, 0, 1, 1], [], []>} : vector<64x128xbf16>, vector<128x128xbf16>, vector<64x128xf32> -> vector<64x128xf32>
    %76 = arith.addf %71, %75 : vector<64x128xf32>
    %77 = vector.extract_strided_slice %43 {offsets = [32, 0], sizes = [64, 128], strides = [1, 1]} : vector<96x128xbf16> to vector<64x128xbf16>
    %c6 = arith.constant 6 : index
    %c0_36 = arith.constant 0 : index
    %c0_37 = arith.constant 0 : index
    %78 = vector.load %arg5[%c6, %c0_36, %c0_37] : memref<9x128x128xbf16, #tpu.memory_space<vmem>>, vector<1x128x128xbf16>
    %79 = vector.shape_cast %78 : vector<1x128x128xbf16> to vector<128x128xbf16>
    %cst_38 = arith.constant dense<0.000000e+00> : vector<64x128xf32>
    %80 = tpu.matmul %77, %79, %cst_38 {dimension_numbers = #tpu.dot_dimension_numbers<[1], [0], [0], [1], [0, 0, 1, 1], [], []>} : vector<64x128xbf16>, vector<128x128xbf16>, vector<64x128xf32> -> vector<64x128xf32>
    %81 = arith.addf %76, %80 : vector<64x128xf32>
    %82 = vector.extract_strided_slice %12 {offsets = [32, 0], sizes = [64, 128], strides = [1, 1]} : vector<96x128xbf16> to vector<64x128xbf16>
    %c7 = arith.constant 7 : index
    %c0_39 = arith.constant 0 : index
    %c0_40 = arith.constant 0 : index
    %83 = vector.load %arg5[%c7, %c0_39, %c0_40] : memref<9x128x128xbf16, #tpu.memory_space<vmem>>, vector<1x128x128xbf16>
    %84 = vector.shape_cast %83 : vector<1x128x128xbf16> to vector<128x128xbf16>
    %cst_41 = arith.constant dense<0.000000e+00> : vector<64x128xf32>
    %85 = tpu.matmul %82, %84, %cst_41 {dimension_numbers = #tpu.dot_dimension_numbers<[1], [0], [0], [1], [0, 0, 1, 1], [], []>} : vector<64x128xbf16>, vector<128x128xbf16>, vector<64x128xf32> -> vector<64x128xf32>
    %86 = arith.addf %81, %85 : vector<64x128xf32>
    %87 = vector.extract_strided_slice %45 {offsets = [32, 0], sizes = [64, 128], strides = [1, 1]} : vector<96x128xbf16> to vector<64x128xbf16>
    %c8 = arith.constant 8 : index
    %c0_42 = arith.constant 0 : index
    %c0_43 = arith.constant 0 : index
    %88 = vector.load %arg5[%c8, %c0_42, %c0_43] : memref<9x128x128xbf16, #tpu.memory_space<vmem>>, vector<1x128x128xbf16>
    %89 = vector.shape_cast %88 : vector<1x128x128xbf16> to vector<128x128xbf16>
    %cst_44 = arith.constant dense<0.000000e+00> : vector<64x128xf32>
    %90 = tpu.matmul %87, %89, %cst_44 {dimension_numbers = #tpu.dot_dimension_numbers<[1], [0], [0], [1], [0, 0, 1, 1], [], []>} : vector<64x128xbf16>, vector<128x128xbf16>, vector<64x128xf32> -> vector<64x128xf32>
    %91 = arith.addf %86, %90 : vector<64x128xf32>
    %92 = arith.truncf %91 : vector<64x128xf32> to vector<64x128xbf16>
    %c0_45 = arith.constant 0 : index
    %c0_46 = arith.constant 0 : index
    %c0_47 = arith.constant 0 : index
    %93 = vector.load %arg6[%c0_45, %c0_46, %c0_47] : memref<1x64x128xbf16, #tpu.memory_space<vmem>>, vector<1x64x128xbf16>
    %94 = vector.shape_cast %93 : vector<1x64x128xbf16> to vector<64x128xbf16>
    %95 = vector.shape_cast %92 : vector<64x128xbf16> to vector<1x64x128xbf16>
    tpu.vector_store %arg6[%c0_45, %c0_46, %c0_47], %95 {strides = array<i32>} : memref<1x64x128xbf16, #tpu.memory_space<vmem>>, vector<1x64x128xbf16>,
    %cst_48 = arith.constant dense<0.000000e+00> : vector<128xf32>
    %96 = vector.multi_reduction <add>, %91, %cst_48 [0] : vector<64x128xf32> to vector<128xf32>
    %97 = vector.shape_cast %96 : vector<128xf32> to vector<1x128xf32>
    %98 = arith.mulf %91, %91 : vector<64x128xf32>
    %cst_49 = arith.constant dense<0.000000e+00> : vector<128xf32>
    %99 = vector.multi_reduction <add>, %98, %cst_49 [0] : vector<64x128xf32> to vector<128xf32>
    %100 = vector.shape_cast %99 : vector<128xf32> to vector<1x128xf32>
    %101 = tpu.concatenate %97, %100 in 0 : vector<1x128xf32>, vector<1x128xf32> -> vector<2x128xf32>
    %c0_50 = arith.constant 0 : index
    %c0_51 = arith.constant 0 : index
    %c0_52 = arith.constant 0 : index
    %c0_53 = arith.constant 0 : index
    %102 = vector.load %arg7[%c0_50, %c0_51, %c0_52, %c0_53] : memref<1x1x2x128xf32, #tpu.memory_space<vmem>>, vector<1x1x2x128xf32>
    %103 = vector.shape_cast %102 : vector<1x1x2x128xf32> to vector<2x128xf32>
    %104 = vector.shape_cast %101 : vector<2x128xf32> to vector<1x1x2x128xf32>
    tpu.vector_store %arg7[%c0_50, %c0_51, %c0_52, %c0_53], %104 {strides = array<i32>} : memref<1x1x2x128xf32, #tpu.memory_space<vmem>>, vector<1x1x2x128xf32>,
    return
  }
  func.func @transform_0(%arg0: i32, %arg1: i32) -> (i32, i32, i32) {
    %c4_i32 = arith.constant 4 : i32
    %0 = arith.muli %arg1, %c4_i32 : i32
    %c1_i32 = arith.constant 1 : i32
    %1 = arith.subi %0, %c1_i32 : i32
    %c0_i32 = arith.constant 0 : i32
    %2 = arith.maxsi %1, %c0_i32 : i32
    %c0_i32_0 = arith.constant 0 : i32
    %c0_i32_1 = arith.constant 0 : i32
    return %arg0, %2, %c0_i32_0 : i32, i32, i32
  }
  func.func @transform_1(%arg0: i32, %arg1: i32) -> (i32, i32, i32) {
    %c0_i32 = arith.constant 0 : i32
    %c0_i32_0 = arith.constant 0 : i32
    return %arg0, %arg1, %c0_i32 : i32, i32, i32
  }
  func.func @transform_2(%arg0: i32, %arg1: i32) -> (i32, i32, i32) {
    %c1_i32 = arith.constant 1 : i32
    %0 = arith.addi %arg1, %c1_i32 : i32
    %c4_i32 = arith.constant 4 : i32
    %1 = arith.muli %0, %c4_i32 : i32
    %c15_i32 = arith.constant 15 : i32
    %2 = arith.minsi %1, %c15_i32 : i32
    %c0_i32 = arith.constant 0 : i32
    %c0_i32_0 = arith.constant 0 : i32
    return %arg0, %2, %c0_i32 : i32, i32, i32
  }
  func.func @transform_3(%arg0: i32, %arg1: i32) -> (i32, i32, i32) {
    %c0_i32 = arith.constant 0 : i32
    %c0_i32_0 = arith.constant 0 : i32
    %c0_i32_1 = arith.constant 0 : i32
    %c0_i32_2 = arith.constant 0 : i32
    return %c0_i32, %c0_i32_0, %c0_i32_1 : i32, i32, i32
  }
  func.func @transform_4(%arg0: i32, %arg1: i32) -> (i32, i32, i32) {
    %c0_i32 = arith.constant 0 : i32
    %c0_i32_0 = arith.constant 0 : i32
    return %arg0, %arg1, %c0_i32 : i32, i32, i32
  }
  func.func @transform_5(%arg0: i32, %arg1: i32) -> (i32, i32, i32, i32) {
    %c0_i32 = arith.constant 0 : i32
    %c0_i32_0 = arith.constant 0 : i32
    %c0_i32_1 = arith.constant 0 : i32
    return %arg0, %arg1, %c0_i32, %c0_i32_0 : i32, i32, i32, i32
  }
}

module attributes {stable_mosaic.version = 11 : i64} {
  func.func @bn_relu_conv_kernel(%arg0: i32, %arg1: i32, %arg2: memref<1x128xf32, #tpu.memory_space<vmem>>, %arg3: memref<1x128xf32, #tpu.memory_space<vmem>>, %arg4: memref<1x16x128xbf16, #tpu.memory_space<vmem>>, %arg5: memref<1x64x128xbf16, #tpu.memory_space<vmem>>, %arg6: memref<1x16x128xbf16, #tpu.memory_space<vmem>>, %arg7: memref<9x128x128xbf16, #tpu.memory_space<vmem>>, %arg8: memref<1x64x128xbf16, #tpu.memory_space<vmem>>, %arg9: memref<1x1x2x128xf32, #tpu.memory_space<vmem>>) attributes {dimension_semantics = [#tpu.dimension_semantics<parallel>, #tpu.dimension_semantics<parallel>], iteration_bounds = array<i64: 2, 4>, scalar_prefetch = 0 : i64, scratch_operands = 0 : i64, tpu.core_type = #tpu.core_type<tc>, window_params = [{pipeline_mode = #tpu.pipeline_mode<synchronous>, transform_indices = @transform_0, window_bounds = array<i64: 1, 128>}, {pipeline_mode = #tpu.pipeline_mode<synchronous>, transform_indices = @transform_1, window_bounds = array<i64: 1, 128>}, {transform_indices = @transform_2, window_bounds = array<i64: 1, 16, 128>}, {transform_indices = @transform_3, window_bounds = array<i64: 1, 64, 128>}, {transform_indices = @transform_4, window_bounds = array<i64: 1, 16, 128>}, {pipeline_mode = #tpu.pipeline_mode<synchronous>, transform_indices = @transform_5, window_bounds = array<i64: 9, 128, 128>}, {transform_indices = @transform_6, window_bounds = array<i64: 1, 64, 128>}, {transform_indices = @transform_7, window_bounds = array<i64: 1, 1, 2, 128>}]} {
    %c0 = arith.constant 0 : index
    %c0_0 = arith.constant 0 : index
    %c0_1 = arith.constant 0 : index
    %0 = vector.load %arg4[%c0, %c0_0, %c0_1] : memref<1x16x128xbf16, #tpu.memory_space<vmem>>, vector<1x16x128xbf16>
    %1 = vector.shape_cast %0 : vector<1x16x128xbf16> to vector<16x128xbf16>
    %2 = arith.extf %1 : vector<16x128xbf16> to vector<16x128xf32>
    %c0_2 = arith.constant 0 : index
    %c0_3 = arith.constant 0 : index
    %3 = vector.load %arg2[%c0_2, %c0_3] : memref<1x128xf32, #tpu.memory_space<vmem>>, vector<1x128xf32>
    %4 = vector.broadcast %3 : vector<1x128xf32> to vector<16x128xf32>
    %5 = arith.mulf %2, %4 : vector<16x128xf32>
    %c0_4 = arith.constant 0 : index
    %c0_5 = arith.constant 0 : index
    %6 = vector.load %arg3[%c0_4, %c0_5] : memref<1x128xf32, #tpu.memory_space<vmem>>, vector<1x128xf32>
    %7 = vector.broadcast %6 : vector<1x128xf32> to vector<16x128xf32>
    %8 = arith.addf %5, %7 : vector<16x128xf32>
    %cst = arith.constant 0.000000e+00 : f32
    %9 = vector.broadcast %cst : f32 to vector<16x128xf32>
    %10 = arith.maximumf %8, %9 : vector<16x128xf32>
    %11 = arith.truncf %10 : vector<16x128xf32> to vector<16x128xbf16>
    %c0_6 = arith.constant 0 : index
    %c0_7 = arith.constant 0 : index
    %c0_8 = arith.constant 0 : index
    %12 = vector.load %arg6[%c0_6, %c0_7, %c0_8] : memref<1x16x128xbf16, #tpu.memory_space<vmem>>, vector<1x16x128xbf16>
    %13 = vector.shape_cast %12 : vector<1x16x128xbf16> to vector<16x128xbf16>
    %14 = arith.extf %13 : vector<16x128xbf16> to vector<16x128xf32>
    %c0_9 = arith.constant 0 : index
    %c0_10 = arith.constant 0 : index
    %15 = vector.load %arg2[%c0_9, %c0_10] : memref<1x128xf32, #tpu.memory_space<vmem>>, vector<1x128xf32>
    %16 = vector.broadcast %15 : vector<1x128xf32> to vector<16x128xf32>
    %17 = arith.mulf %14, %16 : vector<16x128xf32>
    %c0_11 = arith.constant 0 : index
    %c0_12 = arith.constant 0 : index
    %18 = vector.load %arg3[%c0_11, %c0_12] : memref<1x128xf32, #tpu.memory_space<vmem>>, vector<1x128xf32>
    %19 = vector.broadcast %18 : vector<1x128xf32> to vector<16x128xf32>
    %20 = arith.addf %17, %19 : vector<16x128xf32>
    %cst_13 = arith.constant 0.000000e+00 : f32
    %21 = vector.broadcast %cst_13 : f32 to vector<16x128xf32>
    %22 = arith.maximumf %20, %21 : vector<16x128xf32>
    %23 = arith.truncf %22 : vector<16x128xf32> to vector<16x128xbf16>
    %c0_i32 = arith.constant 0 : i32
    %24 = arith.cmpi sgt, %arg1, %c0_i32 : i32
    %cst_14 = arith.constant 0.000000e+00 : bf16
    %25 = vector.broadcast %cst_14 : bf16 to vector<16x128xbf16>
    %26 = arith.select %24, %11, %25 : vector<16x128xbf16>
    %c3_i32 = arith.constant 3 : i32
    %27 = arith.cmpi slt, %arg1, %c3_i32 : i32
    %cst_15 = arith.constant 0.000000e+00 : bf16
    %28 = vector.broadcast %cst_15 : bf16 to vector<16x128xbf16>
    %29 = arith.select %27, %23, %28 : vector<16x128xbf16>
    %c0_16 = arith.constant 0 : index
    %c0_17 = arith.constant 0 : index
    %c0_18 = arith.constant 0 : index
    %30 = vector.load %arg5[%c0_16, %c0_17, %c0_18] : memref<1x64x128xbf16, #tpu.memory_space<vmem>>, vector<1x64x128xbf16>
    %31 = vector.shape_cast %30 : vector<1x64x128xbf16> to vector<64x128xbf16>
    %32 = arith.extf %31 : vector<64x128xbf16> to vector<64x128xf32>
    %c0_19 = arith.constant 0 : index
    %c0_20 = arith.constant 0 : index
    %33 = vector.load %arg2[%c0_19, %c0_20] : memref<1x128xf32, #tpu.memory_space<vmem>>, vector<1x128xf32>
    %34 = vector.broadcast %33 : vector<1x128xf32> to vector<64x128xf32>
    %35 = arith.mulf %32, %34 : vector<64x128xf32>
    %c0_21 = arith.constant 0 : index
    %c0_22 = arith.constant 0 : index
    %36 = vector.load %arg3[%c0_21, %c0_22] : memref<1x128xf32, #tpu.memory_space<vmem>>, vector<1x128xf32>
    %37 = vector.broadcast %36 : vector<1x128xf32> to vector<64x128xf32>
    %38 = arith.addf %35, %37 : vector<64x128xf32>
    %cst_23 = arith.constant 0.000000e+00 : f32
    %39 = vector.broadcast %cst_23 : f32 to vector<64x128xf32>
    %40 = arith.maximumf %38, %39 : vector<64x128xf32>
    %41 = arith.truncf %40 : vector<64x128xf32> to vector<64x128xbf16>
    %42 = tpu.concatenate %26, %41, %29 in 0 : vector<16x128xbf16>, vector<64x128xbf16>, vector<16x128xbf16> -> vector<96x128xbf16>
    %43 = tpu.iota {dimensions = array<i32: 0>} : vector<96x1xi32>
    %c16_i32 = arith.constant 16 : i32
    %c0_i32_24 = arith.constant 0 : i32
    %44 = arith.cmpi eq, %c16_i32, %c0_i32_24 : i32
    %c1_i32 = arith.constant 1 : i32
    %45 = arith.select %44, %c1_i32, %c16_i32 : i32
    %46 = vector.broadcast %45 : i32 to vector<96x1xi32>
    %47 = arith.remsi %43, %46 : vector<96x1xi32>
    %c0_i32_25 = arith.constant 0 : i32
    %48 = vector.broadcast %c0_i32_25 : i32 to vector<96x1xi32>
    %49 = arith.cmpi ne, %47, %48 : vector<96x1xi32>
    %c0_i32_26 = arith.constant 0 : i32
    %50 = vector.broadcast %c0_i32_26 : i32 to vector<96x1xi32>
    %51 = arith.cmpi slt, %47, %50 : vector<96x1xi32>
    %c0_i32_27 = arith.constant 0 : i32
    %52 = arith.cmpi slt, %45, %c0_i32_27 : i32
    %53 = vector.broadcast %52 : i1 to vector<96x1xi1>
    %54 = vector.broadcast %53 : vector<96x1xi1> to vector<96x1xi1>
    %55 = arith.xori %51, %54 : vector<96x1xi1>
    %56 = arith.andi %55, %49 : vector<96x1xi1>
    %57 = vector.broadcast %45 : i32 to vector<96x1xi32>
    %58 = arith.addi %47, %57 : vector<96x1xi32>
    %59 = arith.select %56, %58, %47 : vector<96x1xi1>, vector<96x1xi32>
    %cst_28 = arith.constant 0.000000e+00 : bf16
    %60 = vector.broadcast %cst_28 : bf16 to vector<96x128xbf16>
    %c15_i32 = arith.constant 15 : i32
    %61 = vector.broadcast %c15_i32 : i32 to vector<96x1xi32>
    %62 = arith.cmpi ne, %59, %61 : vector<96x1xi32>
    %63 = vector.shape_cast %62 : vector<96x1xi1> to vector<96x1xi1>
    %64 = vector.broadcast %63 : vector<96x1xi1> to vector<96x128xi1>
    %65 = arith.select %64, %42, %60 : vector<96x128xi1>, vector<96x128xbf16>
    %c0_i32_29 = arith.constant 0 : i32
    %66 = vector.broadcast %c0_i32_29 : i32 to vector<96x1xi32>
    %67 = arith.cmpi ne, %59, %66 : vector<96x1xi32>
    %68 = vector.shape_cast %67 : vector<96x1xi1> to vector<96x1xi1>
    %69 = vector.broadcast %68 : vector<96x1xi1> to vector<96x128xi1>
    %70 = arith.select %69, %42, %60 : vector<96x128xi1>, vector<96x128xbf16>
    %cst_30 = arith.constant 0.000000e+00 : bf16
    %71 = vector.broadcast %cst_30 : bf16 to vector<1x128xbf16>
    %72 = vector.extract_strided_slice %65 {offsets = [0, 0], sizes = [95, 128], strides = [1, 1]} : vector<96x128xbf16> to vector<95x128xbf16>
    %73 = tpu.concatenate %71, %72 in 0 : vector<1x128xbf16>, vector<95x128xbf16> -> vector<96x128xbf16>
    %74 = vector.extract_strided_slice %70 {offsets = [1, 0], sizes = [95, 128], strides = [1, 1]} : vector<96x128xbf16> to vector<95x128xbf16>
    %75 = tpu.concatenate %74, %71 in 0 : vector<95x128xbf16>, vector<1x128xbf16> -> vector<96x128xbf16>
    %cst_31 = arith.constant 0.000000e+00 : f32
    %76 = vector.broadcast %cst_31 : f32 to vector<64x128xf32>
    %77 = vector.extract_strided_slice %73 {offsets = [0, 0], sizes = [64, 128], strides = [1, 1]} : vector<96x128xbf16> to vector<64x128xbf16>
    %c0_32 = arith.constant 0 : index
    %c0_33 = arith.constant 0 : index
    %c0_34 = arith.constant 0 : index
    %78 = vector.load %arg7[%c0_32, %c0_33, %c0_34] : memref<9x128x128xbf16, #tpu.memory_space<vmem>>, vector<1x128x128xbf16>
    %79 = vector.shape_cast %78 : vector<1x128x128xbf16> to vector<128x128xbf16>
    %cst_35 = arith.constant dense<0.000000e+00> : vector<64x128xf32>
    %80 = tpu.matmul %77, %79, %cst_35 {dimension_numbers = #tpu.dot_dimension_numbers<[1], [0], [0], [1], [0, 0, 1, 1], [], []>} : vector<64x128xbf16>, vector<128x128xbf16>, vector<64x128xf32> -> vector<64x128xf32>
    %81 = arith.addf %76, %80 : vector<64x128xf32>
    %82 = vector.extract_strided_slice %42 {offsets = [0, 0], sizes = [64, 128], strides = [1, 1]} : vector<96x128xbf16> to vector<64x128xbf16>
    %c1 = arith.constant 1 : index
    %c0_36 = arith.constant 0 : index
    %c0_37 = arith.constant 0 : index
    %83 = vector.load %arg7[%c1, %c0_36, %c0_37] : memref<9x128x128xbf16, #tpu.memory_space<vmem>>, vector<1x128x128xbf16>
    %84 = vector.shape_cast %83 : vector<1x128x128xbf16> to vector<128x128xbf16>
    %cst_38 = arith.constant dense<0.000000e+00> : vector<64x128xf32>
    %85 = tpu.matmul %82, %84, %cst_38 {dimension_numbers = #tpu.dot_dimension_numbers<[1], [0], [0], [1], [0, 0, 1, 1], [], []>} : vector<64x128xbf16>, vector<128x128xbf16>, vector<64x128xf32> -> vector<64x128xf32>
    %86 = arith.addf %81, %85 : vector<64x128xf32>
    %87 = vector.extract_strided_slice %75 {offsets = [0, 0], sizes = [64, 128], strides = [1, 1]} : vector<96x128xbf16> to vector<64x128xbf16>
    %c2 = arith.constant 2 : index
    %c0_39 = arith.constant 0 : index
    %c0_40 = arith.constant 0 : index
    %88 = vector.load %arg7[%c2, %c0_39, %c0_40] : memref<9x128x128xbf16, #tpu.memory_space<vmem>>, vector<1x128x128xbf16>
    %89 = vector.shape_cast %88 : vector<1x128x128xbf16> to vector<128x128xbf16>
    %cst_41 = arith.constant dense<0.000000e+00> : vector<64x128xf32>
    %90 = tpu.matmul %87, %89, %cst_41 {dimension_numbers = #tpu.dot_dimension_numbers<[1], [0], [0], [1], [0, 0, 1, 1], [], []>} : vector<64x128xbf16>, vector<128x128xbf16>, vector<64x128xf32> -> vector<64x128xf32>
    %91 = arith.addf %86, %90 : vector<64x128xf32>
    %92 = vector.extract_strided_slice %73 {offsets = [16, 0], sizes = [64, 128], strides = [1, 1]} : vector<96x128xbf16> to vector<64x128xbf16>
    %c3 = arith.constant 3 : index
    %c0_42 = arith.constant 0 : index
    %c0_43 = arith.constant 0 : index
    %93 = vector.load %arg7[%c3, %c0_42, %c0_43] : memref<9x128x128xbf16, #tpu.memory_space<vmem>>, vector<1x128x128xbf16>
    %94 = vector.shape_cast %93 : vector<1x128x128xbf16> to vector<128x128xbf16>
    %cst_44 = arith.constant dense<0.000000e+00> : vector<64x128xf32>
    %95 = tpu.matmul %92, %94, %cst_44 {dimension_numbers = #tpu.dot_dimension_numbers<[1], [0], [0], [1], [0, 0, 1, 1], [], []>} : vector<64x128xbf16>, vector<128x128xbf16>, vector<64x128xf32> -> vector<64x128xf32>
    %96 = arith.addf %91, %95 : vector<64x128xf32>
    %97 = vector.extract_strided_slice %42 {offsets = [16, 0], sizes = [64, 128], strides = [1, 1]} : vector<96x128xbf16> to vector<64x128xbf16>
    %c4 = arith.constant 4 : index
    %c0_45 = arith.constant 0 : index
    %c0_46 = arith.constant 0 : index
    %98 = vector.load %arg7[%c4, %c0_45, %c0_46] : memref<9x128x128xbf16, #tpu.memory_space<vmem>>, vector<1x128x128xbf16>
    %99 = vector.shape_cast %98 : vector<1x128x128xbf16> to vector<128x128xbf16>
    %cst_47 = arith.constant dense<0.000000e+00> : vector<64x128xf32>
    %100 = tpu.matmul %97, %99, %cst_47 {dimension_numbers = #tpu.dot_dimension_numbers<[1], [0], [0], [1], [0, 0, 1, 1], [], []>} : vector<64x128xbf16>, vector<128x128xbf16>, vector<64x128xf32> -> vector<64x128xf32>
    %101 = arith.addf %96, %100 : vector<64x128xf32>
    %102 = vector.extract_strided_slice %75 {offsets = [16, 0], sizes = [64, 128], strides = [1, 1]} : vector<96x128xbf16> to vector<64x128xbf16>
    %c5 = arith.constant 5 : index
    %c0_48 = arith.constant 0 : index
    %c0_49 = arith.constant 0 : index
    %103 = vector.load %arg7[%c5, %c0_48, %c0_49] : memref<9x128x128xbf16, #tpu.memory_space<vmem>>, vector<1x128x128xbf16>
    %104 = vector.shape_cast %103 : vector<1x128x128xbf16> to vector<128x128xbf16>
    %cst_50 = arith.constant dense<0.000000e+00> : vector<64x128xf32>
    %105 = tpu.matmul %102, %104, %cst_50 {dimension_numbers = #tpu.dot_dimension_numbers<[1], [0], [0], [1], [0, 0, 1, 1], [], []>} : vector<64x128xbf16>, vector<128x128xbf16>, vector<64x128xf32> -> vector<64x128xf32>
    %106 = arith.addf %101, %105 : vector<64x128xf32>
    %107 = vector.extract_strided_slice %73 {offsets = [32, 0], sizes = [64, 128], strides = [1, 1]} : vector<96x128xbf16> to vector<64x128xbf16>
    %c6 = arith.constant 6 : index
    %c0_51 = arith.constant 0 : index
    %c0_52 = arith.constant 0 : index
    %108 = vector.load %arg7[%c6, %c0_51, %c0_52] : memref<9x128x128xbf16, #tpu.memory_space<vmem>>, vector<1x128x128xbf16>
    %109 = vector.shape_cast %108 : vector<1x128x128xbf16> to vector<128x128xbf16>
    %cst_53 = arith.constant dense<0.000000e+00> : vector<64x128xf32>
    %110 = tpu.matmul %107, %109, %cst_53 {dimension_numbers = #tpu.dot_dimension_numbers<[1], [0], [0], [1], [0, 0, 1, 1], [], []>} : vector<64x128xbf16>, vector<128x128xbf16>, vector<64x128xf32> -> vector<64x128xf32>
    %111 = arith.addf %106, %110 : vector<64x128xf32>
    %112 = vector.extract_strided_slice %42 {offsets = [32, 0], sizes = [64, 128], strides = [1, 1]} : vector<96x128xbf16> to vector<64x128xbf16>
    %c7 = arith.constant 7 : index
    %c0_54 = arith.constant 0 : index
    %c0_55 = arith.constant 0 : index
    %113 = vector.load %arg7[%c7, %c0_54, %c0_55] : memref<9x128x128xbf16, #tpu.memory_space<vmem>>, vector<1x128x128xbf16>
    %114 = vector.shape_cast %113 : vector<1x128x128xbf16> to vector<128x128xbf16>
    %cst_56 = arith.constant dense<0.000000e+00> : vector<64x128xf32>
    %115 = tpu.matmul %112, %114, %cst_56 {dimension_numbers = #tpu.dot_dimension_numbers<[1], [0], [0], [1], [0, 0, 1, 1], [], []>} : vector<64x128xbf16>, vector<128x128xbf16>, vector<64x128xf32> -> vector<64x128xf32>
    %116 = arith.addf %111, %115 : vector<64x128xf32>
    %117 = vector.extract_strided_slice %75 {offsets = [32, 0], sizes = [64, 128], strides = [1, 1]} : vector<96x128xbf16> to vector<64x128xbf16>
    %c8 = arith.constant 8 : index
    %c0_57 = arith.constant 0 : index
    %c0_58 = arith.constant 0 : index
    %118 = vector.load %arg7[%c8, %c0_57, %c0_58] : memref<9x128x128xbf16, #tpu.memory_space<vmem>>, vector<1x128x128xbf16>
    %119 = vector.shape_cast %118 : vector<1x128x128xbf16> to vector<128x128xbf16>
    %cst_59 = arith.constant dense<0.000000e+00> : vector<64x128xf32>
    %120 = tpu.matmul %117, %119, %cst_59 {dimension_numbers = #tpu.dot_dimension_numbers<[1], [0], [0], [1], [0, 0, 1, 1], [], []>} : vector<64x128xbf16>, vector<128x128xbf16>, vector<64x128xf32> -> vector<64x128xf32>
    %121 = arith.addf %116, %120 : vector<64x128xf32>
    %122 = arith.truncf %121 : vector<64x128xf32> to vector<64x128xbf16>
    %c0_60 = arith.constant 0 : index
    %c0_61 = arith.constant 0 : index
    %c0_62 = arith.constant 0 : index
    %123 = vector.load %arg8[%c0_60, %c0_61, %c0_62] : memref<1x64x128xbf16, #tpu.memory_space<vmem>>, vector<1x64x128xbf16>
    %124 = vector.shape_cast %123 : vector<1x64x128xbf16> to vector<64x128xbf16>
    %125 = vector.shape_cast %122 : vector<64x128xbf16> to vector<1x64x128xbf16>
    tpu.vector_store %arg8[%c0_60, %c0_61, %c0_62], %125 {strides = array<i32>} : memref<1x64x128xbf16, #tpu.memory_space<vmem>>, vector<1x64x128xbf16>,
    %cst_63 = arith.constant dense<0.000000e+00> : vector<128xf32>
    %126 = vector.multi_reduction <add>, %121, %cst_63 [0] : vector<64x128xf32> to vector<128xf32>
    %127 = vector.shape_cast %126 : vector<128xf32> to vector<1x128xf32>
    %128 = arith.mulf %121, %121 : vector<64x128xf32>
    %cst_64 = arith.constant dense<0.000000e+00> : vector<128xf32>
    %129 = vector.multi_reduction <add>, %128, %cst_64 [0] : vector<64x128xf32> to vector<128xf32>
    %130 = vector.shape_cast %129 : vector<128xf32> to vector<1x128xf32>
    %131 = tpu.concatenate %127, %130 in 0 : vector<1x128xf32>, vector<1x128xf32> -> vector<2x128xf32>
    %c0_65 = arith.constant 0 : index
    %c0_66 = arith.constant 0 : index
    %c0_67 = arith.constant 0 : index
    %c0_68 = arith.constant 0 : index
    %132 = vector.load %arg9[%c0_65, %c0_66, %c0_67, %c0_68] : memref<1x1x2x128xf32, #tpu.memory_space<vmem>>, vector<1x1x2x128xf32>
    %133 = vector.shape_cast %132 : vector<1x1x2x128xf32> to vector<2x128xf32>
    %134 = vector.shape_cast %131 : vector<2x128xf32> to vector<1x1x2x128xf32>
    tpu.vector_store %arg9[%c0_65, %c0_66, %c0_67, %c0_68], %134 {strides = array<i32>} : memref<1x1x2x128xf32, #tpu.memory_space<vmem>>, vector<1x1x2x128xf32>,
    return
  }
  func.func @transform_0(%arg0: i32, %arg1: i32) -> (i32, i32) {
    %c0_i32 = arith.constant 0 : i32
    %c0_i32_0 = arith.constant 0 : i32
    %c0_i32_1 = arith.constant 0 : i32
    return %c0_i32, %c0_i32_0 : i32, i32
  }
  func.func @transform_1(%arg0: i32, %arg1: i32) -> (i32, i32) {
    %c0_i32 = arith.constant 0 : i32
    %c0_i32_0 = arith.constant 0 : i32
    %c0_i32_1 = arith.constant 0 : i32
    return %c0_i32, %c0_i32_0 : i32, i32
  }
  func.func @transform_2(%arg0: i32, %arg1: i32) -> (i32, i32, i32) {
    %c4_i32 = arith.constant 4 : i32
    %0 = arith.muli %arg1, %c4_i32 : i32
    %c1_i32 = arith.constant 1 : i32
    %1 = arith.subi %0, %c1_i32 : i32
    %c0_i32 = arith.constant 0 : i32
    %2 = arith.maxsi %1, %c0_i32 : i32
    %c0_i32_0 = arith.constant 0 : i32
    %c0_i32_1 = arith.constant 0 : i32
    return %arg0, %2, %c0_i32_0 : i32, i32, i32
  }
  func.func @transform_3(%arg0: i32, %arg1: i32) -> (i32, i32, i32) {
    %c0_i32 = arith.constant 0 : i32
    %c0_i32_0 = arith.constant 0 : i32
    return %arg0, %arg1, %c0_i32 : i32, i32, i32
  }
  func.func @transform_4(%arg0: i32, %arg1: i32) -> (i32, i32, i32) {
    %c1_i32 = arith.constant 1 : i32
    %0 = arith.addi %arg1, %c1_i32 : i32
    %c4_i32 = arith.constant 4 : i32
    %1 = arith.muli %0, %c4_i32 : i32
    %c15_i32 = arith.constant 15 : i32
    %2 = arith.minsi %1, %c15_i32 : i32
    %c0_i32 = arith.constant 0 : i32
    %c0_i32_0 = arith.constant 0 : i32
    return %arg0, %2, %c0_i32 : i32, i32, i32
  }
  func.func @transform_5(%arg0: i32, %arg1: i32) -> (i32, i32, i32) {
    %c0_i32 = arith.constant 0 : i32
    %c0_i32_0 = arith.constant 0 : i32
    %c0_i32_1 = arith.constant 0 : i32
    %c0_i32_2 = arith.constant 0 : i32
    return %c0_i32, %c0_i32_0, %c0_i32_1 : i32, i32, i32
  }
  func.func @transform_6(%arg0: i32, %arg1: i32) -> (i32, i32, i32) {
    %c0_i32 = arith.constant 0 : i32
    %c0_i32_0 = arith.constant 0 : i32
    return %arg0, %arg1, %c0_i32 : i32, i32, i32
  }
  func.func @transform_7(%arg0: i32, %arg1: i32) -> (i32, i32, i32, i32) {
    %c0_i32 = arith.constant 0 : i32
    %c0_i32_0 = arith.constant 0 : i32
    %c0_i32_1 = arith.constant 0 : i32
    return %arg0, %arg1, %c0_i32, %c0_i32_0 : i32, i32, i32, i32
  }
}

</mosaic_0001>

<bundles_post_ra>
// kernel: basic_residual_block.3
= control target key start
LH: loop header
LB: loop body
LE: loop exit
PB: predicated region body
PF: predicated region fallthrough
CT: control target
= control target key end

     0   :  { %s3340_s24 = smov 0   ;;  %s3342_s25 = smov 0   ;;  %s3947_s0 = inlined_call_operand.vmem [shape: f32[1,128], index: 0, kind: input, shape index: {}]   ;;  %s3948_s1 = inlined_call_operand.vmem [shape: f32[1,128], index: 1, kind: input, shape index: {}]   ;;  %s3949_s2 = inlined_call_operand.vmem [shape: bf16[2,256,128], index: 2, kind: input, shape index: {}, may-alias: {2,3,4}]   ;;  %s3950_s3 = inlined_call_operand.vmem [shape: bf16[2,256,128], index: 3, kind: input, shape index: {}, may-alias: {2,3,4}]   ;;  %s3951_s4 = inlined_call_operand.vmem [shape: bf16[2,256,128], index: 4, kind: input, shape index: {}, may-alias: {2,3,4}]   ;;  %s3952_s5 = inlined_call_operand.vmem [shape: bf16[9,128,128], index: 5, kind: input, shape index: {}]   ;;  %s3953_s6 = inlined_call_operand.vmem [shape: bf16[2,256,128], index: 6, kind: output, shape index: {0}]   ;;  %s3954_s7 = inlined_call_operand.vmem [shape: f32[2,4,2,128], index: 7, kind: output, shape index: {1}]  }
   0x1   :  { %s3344_s26 = smov 0   ;;  %s3346_s27 = smov 0  }
   0x2   :  { %s3348_s28 = smov 0  }
   0x3 LB: > { %s27_s29 = sadd.s32 1, %s3288_s26  ;;  %s30_s30 = sadd.s32 1, %s3292_s27  ;;  %s3296_s28 = sphi %s3348_s28, %s18_s28   ;;  %s3292_s27 = sphi %s3346_s27, %s3975_s27   ;;  %s3288_s26 = sphi %s3344_s26, %s3974_s26   ;;  %s3284_s25 = sphi %s3342_s25, %s3973_s25   ;;  %s3280_s24 = sphi %s3340_s24, %s3972_s24  }
   0x4   : > { %p28_p0 = scmp.ge.s32.totalorder %s27_s29, 4  ;;  %p2496_p1 = scmp.ge.s32.totalorder %s3296_s28, 1 }
   0x5   : > { %p329_p2 = scmp.lt.s32.totalorder %s3296_s28, 9 }
   0x6   : > { %s3977_s29 = smov (%p28_p0, %s27_s29), 0  ;;  %s3979_s30 = smov (!%p28_p0, %s30_s30), %s3292_s27 }
   0x7   : > { %p330_p3 = pnand %p2496_p1, %p329_p2  ;;  %p32_p4 = scmp.ge.s32.totalorder %s3979_s30, 2 }
   0x9   : > { %s3981_s30 = smov (%p32_p4, %s3979_s30), 0  ;;  %333 = sbr.rel (%p330_p3) target bundleno = 406 (0x196), region = 44 }
   0xe   : > { %v3186_v0 = vld [vmem:[%s3952_s5 + $0x78] sm:$0xff]   ;;  %s2497_s10 = sshll.u32 %s3280_s24, 2  ;;  %v3188_v2 = vld [vmem:[%s3952_s5 + $0x70] sm:$0xff]   ;;  %p408_p6 = scmp.lt.s32.totalorder %s3284_s25, 1  ;;  %v3190_v4 = vld [vmem:[%s3952_s5 + $0x68] sm:$0xff]   ;;  %v560_v10 = vlaneseq  ;;  %vm3298_vm0 = vmmov 1  }
   0xf   : > { %v3187_v1 = vld [vmem:[%s3952_s5 + $0x38] sm:$0xff]   ;;  %s2498_s13 = sadd.s32 4294967295, %s2497_s10  ;;  %2912 = vmatprep.subr.bf16.mxu0 %v3186_v0  ;;  %v3189_v3 = vld [vmem:[%s3952_s5 + $0x30] sm:$0xff]   ;;  %v3191_v5 = vld [vmem:[%s3952_s5 + $0x28] sm:$0xff]   ;;  %s2502_s14 = sshll.u32 %s3280_s24, 3  ;;  %v3299_v26 = vmov 0  }
  0x10   : > { %p405_p5 = scmp.gt.s32.totalorder %s2498_s13, 0  ;;  %2936 = vmatprep.subr.bf16.mxu1 %v3187_v1  ;;  %2913 = vmatpush3.bf16.msra.mxu0 %v3186_v0  ;;  %s3985_s25 = smov (!%p408_p6, %s3284_s25), 1  ;;  %v3192_v6 = vld [vmem:[%s3952_s5 + $0x60] sm:$0xff]   ;;  %v3194_v8 = vld [vmem:[%s3952_s5 + $0x58] sm:$0xff]   ;;  %v3196_v11 = vld [vmem:[%s3952_s5 + $0x50] sm:$0xff]   ;;  %v3436_v17 = vshrl.u32 %v560_v10, 7 }
  0x11   : > { %2937 = vmatpush3.bf16.msra.mxu1 %v3187_v1  ;;  %2914 = vmatprep.subr.bf16.mxu0 %v3188_v2  ;;  %s3403_s9 = sshll.u32 %s3985_s25, 5  ;;  %v3193_v7 = vld [vmem:[%s3952_s5 + $0x20] sm:$0xff]   ;;  %p424_p8 = scmp.lt.s32.totalorder %s2502_s14, 31  ;;  %v3195_v9 = vld [vmem:[%s3952_s5 + $0x18] sm:$0xff]   ;;  %v3197_v12 = vld [vmem:[%s3952_s5 + $0x10] sm:$0xff]   ;;  %vm951_vm8 = vcmask 1040384  }
  0x12   : > { %s3983_s13 = smov (!%p405_p5, %s2498_s13), 0  ;;  %2938 = vmatprep.subr.bf16.mxu1 %v3189_v3  ;;  %v3431_v14 = vld [vmem:[%s3947_s0] ss:$0 sm:$0xff]  ;;  %p506_p10 = scmp.gt.s32.totalorder %s3280_s24, 0  ;;  %vm753_vm1 = vmpackc.low %vm3298_vm0, %vm3298_vm0  ;;  %v3198_v19 = vld [vmem:[%s3952_s5 + $0x48] sm:$0xff]   ;;  %v562_v22 = vadd.s32 8, %v3436_v17 }
  0x13   : > { %s2499_s22 = sshll.u32 %s3983_s13, 1  ;;  %s3989_s14 = smov (!%p424_p8, %s2502_s14), 31  ;;  %v3447_v18 = vld [vmem:[%s3948_s1] ss:$0 sm:$0xff]  ;;  %v577_v23 = vand.u32 15, %v3436_v17  ;;  %v3199_v25 = vld [vmem:[%s3952_s5 + $0x8] sm:$0xff]  }
  0x14   : > { %2915 = vmatpush3.bf16.msra.mxu0 %v3188_v2  ;;  %p410_p7 = scmp.lt.s32.totalorder %s2499_s22, 31  ;;  %s427_s15 = sadd.s32 %s3403_s9, %s3989_s14  ;;  %v3466_v27 = vsel %vm753_vm1, 65537, %v3299_v26  ;;  %v584_v32 = vand.u32 15, %v562_v22  ;;  %vm897_vm3 = vsmask.f32 256  ;;  %v564_v37 = vadd.s32 24, %v3436_v17 }
  0x15   : > { %2939 = vmatpush3.bf16.msra.mxu1 %v3189_v3  ;;  %2916 = vmatprep.subr.bf16.mxu0 %v3190_v4  ;;  %vm3474_vm2 = vcmp.ne.s32.totalorder %v577_v23, 0  ;;  %v3200_v41 = vld [vmem:[%s3952_s5 + $0x40] sm:$0xff]   ;;  %v3202_v58 = vld [vmem:[%s3952_s5 + $0xb8] sm:$0xff]   ;;  %vm3538_vm14 = vmand %vm951_vm8, %vm897_vm3  ;;  %p461_p12 = scmp.lt.s32.totalorder %s3280_s24, 3 }
  0x16   : > { %2940 = vmatprep.subr.bf16.mxu1 %v3191_v5  ;;  %s3987_s22 = smov (!%p410_p7, %s2499_s22), 31  ;;  %vm843_vm4 = vmpackc.low %vm3474_vm2, %vm3474_vm2  ;;  %vm718_vm6 = vcmp.ne.s32.totalorder %v584_v32, 15  ;;  %v598_v45 = vand.u32 15, %v564_v37  ;;  %v3201_v46 = vld [vmem:[%s3952_s5] sm:$0xff]   ;;  %v3526_v63 = vld [vmem:[%s3952_s5 + $0xf8] sm:$0xff]  }
  0x17   : > { %s413_s13 = sadd.s32 %s3403_s9, %s3987_s22  ;;  %s2745_s22 = sadd.s32 4, %s2497_s10  ;;  %vm754_vm7 = vmpackc.low %vm718_vm6, %vm718_vm6  ;;  %v855_v42 = vsel %vm843_vm4, 65537, %v3299_v26 }
  0x18   : > { %2917 = vmatpush3.bf16.msra.mxu0 %v3190_v4  ;;  %s2501_s17 = sshll.u32 %s413_s13, 2  ;;  %p433_p9 = scmp.lt.s32.totalorder %s2745_s22, 15  ;;  %v766_v49 = vsel %vm754_vm7, 65537, %v3299_v26  ;;  %v2522_v50 = vcombine.low %v855_v42, %v3466_v27  ;;  %vm720_vm9 = vcmp.ne.s32.totalorder %v598_v45, 15  ;;  %v3208_v45 = vld [vmem:[%s3952_s5 + $0xa0] sm:$0xff]  }
  0x19   : > { %2941 = vmatpush3.bf16.msra.mxu1 %v3191_v5  ;;  %2918 = vmatprep.subr.bf16.mxu0 %v3192_v6  ;;  %s415_s23 = scalar_lea.vmem %s3949_s2, %s2501_s17  ;;  %s3433_s10 = sshll.u32 %s427_s15, 2  ;;  %v2516_v51 = vcombine.low %v3466_v27, %v766_v49  ;;  %vm756_vm11 = vmpackc.low %vm720_vm9, %vm720_vm9 }
  0x1a   : > { %2942 = vmatprep.subr.bf16.mxu1 %v3193_v7  ;;  %v2755_v13 = vld [vmem:[%s415_s23] sm:$0xff]   ;;  %s3442_s14 = scalar_lea.vmem %s3950_s3, %s3433_s10  ;;  %s3991_s22 = smov (!%p433_p9, %s2745_s22), 15  ;;  %vm885_vm10 = vcmp.ne.s16.totalorder %v2522_v50, 0  ;;  %v768_v57 = vsel %vm756_vm11, 65537, %v3299_v26  ;;  %vm954_vm11 = vsmask.f32 7424 }
  0x1b   : > { %v2756_v15 = vunpack.c.l.bf16 %v2755_v13  ;;  %v2757_v16 = vunpack.c.h.bf16 %v2755_v13  ;;  %v2763_v24 = vld [vmem:[%s3442_s14] sm:$0xff]   ;;  %s507_s13 = scalar_select %p506_p10, 1, 0  ;;  %v3472_v31 = vld [vmem:[%s3442_s14 + $0x18] sm:$0xff]   ;;  %vm795_vm12 = vcmp.ne.s16.totalorder %v2516_v51, 0  ;;  %v2517_v62 = vcombine.low %v3466_v27, %v768_v57  ;;  %v3207_v57 = vld [vmem:[%s3952_s5 + $0xe8] sm:$0xff]  }
  0x1c   : > { %2919 = vmatpush3.bf16.msra.mxu0 %v3192_v6  ;;  %v2764_v28 = vunpack.c.l.bf16 %v2763_v24  ;;  %s2506_s15 = sshll.u32 %s3991_s22, 1  ;;  %v2765_v35 = vunpack.c.h.bf16 %v2763_v24  ;;  %v2776_v48 = vunpack.c.l.bf16 %v3472_v31  ;;  %v2777_v55 = vunpack.c.h.bf16 %v3472_v31  ;;  %s3921_s17 = scalar_lea.vmem %s3953_s6, %s3433_s10 }
  0x1d   : > { %2943 = vmatpush3.bf16.msra.mxu1 %v3193_v7  ;;  %2920 = vmatprep.subr.bf16.mxu0 %v3194_v8  ;;  %v481_v20 = vmul.f32 %v2756_v15, %v3431_v14  ;;  %v482_v21 = vmul.f32 %v2757_v16, %v3431_v14  ;;  %p3478_p11 = scmp.lt.s32.totalorder %s2506_s15, 31  ;;  %v508_v34 = vstv %s507_s13  ;;  %vm796_vm13 = vcmp.ne.s16.totalorder %v2517_v62, 0  ;;  %v3204_v7 = vld [vmem:[%s3952_s5 + $0xb0] sm:$0xff]   ;;  %v2798_v15 = vld [vmem:[%s3442_s14 + $0x8] sm:$0xff]   ;;  %v3210_v62 = vld [vmem:[%s3952_s5 + $0x98] sm:$0xff]  }
  0x1e   : > { %2944 = vmatprep.subr.bf16.mxu1 %v3195_v9  ;;  %v532_v36 = vmul.f32 %v2764_v28, %v3431_v14  ;;  %vm3487_vm5 = vcmp.eq.s32.totalorder %v508_v34, 1  ;;  %v533_v43 = vmul.f32 %v2765_v35, %v3431_v14  ;;  %v538_v0 = vmul.f32 %v2776_v48, %v3431_v14  ;;  %v3206_v34 = vld [vmem:[%s3952_s5 + $0xa8] sm:$0xff]  }
  0x1f   : > { %v490_v29 = vadd.f32 %v3447_v18, %v481_v20  ;;  %v491_v30 = vadd.f32 %v3447_v18, %v482_v21  ;;  %s3993_s15 = smov (!%p3478_p11, %s2506_s15), 31  ;;  %v566_v16 = vadd.s32 40, %v3436_v17  ;;  %v3554_v20 = vmul.f32 %v2777_v55, %v3431_v14 }
  0x20   : > { %2921 = vmatpush3.bf16.msra.mxu0 %v3194_v8  ;;  %v540_v44 = vadd.f32 %v3447_v18, %v532_v36  ;;  %s441_s20 = sadd.s32 %s3403_s9, %s3993_s15  ;;  %v541_v52 = vadd.f32 %v3447_v18, %v533_v43  ;;  %v3557_v21 = vadd.f32 %v3447_v18, %v538_v0  ;;  %v2769_v28 = vunpack.c.h.bf16 %v2798_v15 }
  0x21   : > { %2945 = vmatpush3.bf16.msra.mxu1 %v3195_v9  ;;  %2922 = vmatprep.subr.bf16.mxu0 %v3196_v11  ;;  %v492_v38 = vmax.f32 %v490_v29, 0.0  ;;  %v493_v39 = vmax.f32 %v491_v30, 0.0  ;;  %s2508_s21 = sshll.u32 %s441_s20, 2  ;;  %v612_v29 = vand.u32 15, %v566_v16  ;;  %v568_v36 = vadd.s32 56, %v3436_v17  ;;  %v3212_v16 = vld [vmem:[%s3952_s5 + $0x90] sm:$0xff]  }
  0x22   : > { %2946 = vmatprep.subr.bf16.mxu1 %v3197_v12  ;;  %v548_v54 = vmax.f32 %v540_v44, 0.0  ;;  %s443_s8 = scalar_lea.vmem %s3951_s4, %s2508_s21  ;;  %v549_v56 = vmax.f32 %v541_v52, 0.0  ;;  %v535_v37 = vmul.f32 %v2769_v28, %v3431_v14  ;;  %v563_v44 = vadd.s32 16, %v3436_v17  ;;  %s2512_s21 = sshll.u32 %s3985_s25, 2 }
  0x23   : > { %v494_v47 = vpack.c.bf16 %v493_v39, %v492_v38  ;;  %v2759_v59 = vld [vmem:[%s443_s8] sm:$0xff]   ;;  %vm722_vm15 = vcmp.ne.s32.totalorder %v612_v29, 15  ;;  %v626_v43 = vand.u32 15, %v568_v36  ;;  %s462_s25 = scalar_select %p461_p12, %s3280_s24, 3 }
  0x24   : > { %2923 = vmatpush3.bf16.msra.mxu0 %v3196_v11  ;;  %v2760_v1 = vunpack.c.l.bf16 %v2759_v59  ;;  %v2761_v2 = vunpack.c.h.bf16 %v2759_v59  ;;  %v3530_v6 = vpack.c.bf16 %v549_v56, %v548_v54  ;;  %vm758_vm0 = vmpackc.low %vm722_vm15, %vm722_vm15  ;;  %v591_v55 = vand.u32 15, %v563_v44  ;;  %v3213_v44 = vld [vmem:[%s3952_s5 + $0xd0] sm:$0xff]   ;;  %s512_s9 = scalar_select %p461_p12, 1, 0 }
  0x25   : > { %2947 = vmatpush3.bf16.msra.mxu1 %v3197_v12  ;;  %2924 = vmatprep.subr.bf16.mxu0 %v3198_v19  ;;  %v510_v53 = vsel %vm3487_vm5, %v494_v47, 0  ;;  %vm724_vm1 = vcmp.ne.s32.totalorder %v626_v43, 15  ;;  %s3698_s15 = sadd.s32 %s2512_s21, %s462_s25 }
  0x26   : > { %2948 = vmatprep.subr.bf16.mxu1 %v3199_v25  ;;  %2928 = vmatprep.mubr.msk.bf16.mxu0 %vm3487_vm5, %v494_v47  ;;  %v801_v60 = vsel %vm795_vm12, %v510_v53, 0  ;;  %v3520_v61 = vsel %vm885_vm10, %v510_v53, 0  ;;  %v3543_v11 = vmul.f32 %v2760_v1, %v3431_v14  ;;  %v3546_v12 = vmul.f32 %v2761_v2, %v3431_v14  ;;  %vm760_vm2 = vmpackc.low %vm724_vm1, %vm724_vm1  ;;  %s2513_s10 = sshll.u32 %s3698_s15, 1 }
  0x27   : > { %v899_v3 = vshrl.u32 %v801_v60, 16  ;;  %v902_v4 = vshll.u32 %v801_v60, 16  ;;  %v956_v5 = vshrl.u32 %v3520_v61, 16  ;;  %v958_v8 = vshll.u32 %v3520_v61, 16  ;;  %s466_s20 = scalar_lea.vmem %s3954_s7, %s2513_s10 }
  0x28   : > { %2925 = vmatpush3.bf16.msra.mxu0 %v3198_v19  ;;  %v802_v13 = vsel %vm796_vm13, %v3530_v6, 0  ;;  %v2799_v19 = vld [vmem:[%s3442_s14 + $0x10] sm:$0xff]   ;;  %v772_v59 = vsel %vm760_vm2, 65537, %v3299_v26  ;;  %v565_v60 = vadd.s32 32, %v3436_v17  ;;  %vm809_vm5 = vcmp.ne.s32.totalorder %v591_v55, 0 }
  0x29   : > { %2949 = vmatpush3.bf16.msra.mxu1 %v3199_v25  ;;  %2926 = vmatprep.subr.bf16.mxu0 %v3200_v41  ;;  %v901_v9 = vrot.slane %v899_v3, 7  ;;  %v906_v23 = vshrl.u32 %v802_v13, 16  ;;  %v909_v24 = vshll.u32 %v802_v13, 16  ;;  %v2768_v25 = vunpack.c.l.bf16 %v2798_v15  ;;  %vm845_vm6 = vmpackc.low %vm809_vm5, %vm809_vm5 }
  0x2a   : > { %2950 = vmatprep.subr.bf16.mxu1 %v3201_v46  ;;  %v2772_v30 = vunpack.c.l.bf16 %v2799_v19  ;;  %v2773_v31 = vunpack.c.h.bf16 %v2799_v19  ;;  %v960_v56 = vrot.slane %v958_v8, 1  ;;  %v2519_v1 = vcombine.low %v3466_v27, %v772_v59  ;;  %v3209_v8 = vld [vmem:[%s3952_s5 + $0xe0] sm:$0xff]  }
  0x2b   : > { %v904_v22 = vor.u32 %v902_v4, %v901_v9  ;;  %v3562_v33 = vrot.slane %v906_v23, 7  ;;  %v534_v35 = vmul.f32 %v2768_v25, %v3431_v14  ;;  %v605_v2 = vand.u32 15, %v565_v60 }
  0x2c   : > { %2927 = vmatpush3.bf16.msra.mxu0 %v3200_v41  ;;  %v536_v38 = vmul.f32 %v2772_v30, %v3431_v14  ;;  %v537_v39 = vmul.f32 %v2773_v31, %v3431_v14  ;;  %v3205_v41 = vld [vmem:[%s3952_s5 + $0xf0] sm:$0xff]   ;;  %v770_v14 = vsel %vm758_vm0, 65537, %v3299_v26  ;;  %v567_v3 = vadd.s32 48, %v3436_v17 }
  0x2d   : > { %2951 = vmatpush3.bf16.msra.mxu1 %v3201_v46  ;;  %2960 = vmatprep.subr.bf16.mxu0 %v3202_v58  ;;  %v953_v32 = vsel %vm3538_vm14, 0, %v904_v22  ;;  %v911_v40 = vor.u32 %v909_v24, %v3562_v33  ;;  %v542_v42 = vadd.f32 %v3447_v18, %v534_v35  ;;  %v543_v46 = vadd.f32 %v3447_v18, %v535_v37 }
  0x2e   : > { %2984 = vmatprep.subr.bf16.mxu1 %v3526_v63  ;;  %2952 = vmatprep.mubr.bf16.mxu1 %v953_v32  ;;  %v544_v47 = vadd.f32 %v3447_v18, %v536_v38  ;;  %v545_v48 = vadd.f32 %v3447_v18, %v537_v39  ;;  %v2518_v51 = vcombine.low %v3466_v27, %v770_v14  ;;  %vm798_vm7 = vcmp.ne.s16.totalorder %v2519_v1, 0 }
  0x2f   : > { %2929 = vmatmul.mubr.bf16.vlgmr.msra.gmra.mxu0 %v3530_v6  ;;  %v3586_v49 = vsel %vm897_vm3, %v901_v9, %v911_v40  ;;  %v550_v50 = vmax.f32 %v542_v42, 0.0  ;;  %v551_v52 = vmax.f32 %v543_v46, 0.0  ;;  %v3611_v4 = vadd.f32 %v3447_v18, %v3543_v11 }
  0x30   : > { %2961 = vmatpush3.bf16.msra.mxu0 %v3202_v58  ;;  %2953 = vmatmul.mubr.bf16.vlgmr.msra.gmra.mxu1 %v3586_v49  ;;  %v552_v53 = vmax.f32 %v544_v47, 0.0  ;;  %v553_v54 = vmax.f32 %v545_v48, 0.0  ;;  %vm3594_vm4 = vcmp.ne.s16.totalorder %v2518_v51, 0  ;;  %v857_v10 = vsel %vm845_vm6, 65537, %v3299_v26 }
  0x31   : > { %2962 = vmatprep.subr.bf16.mxu0 %v3204_v7  ;;  %2985 = vmatpush3.bf16.msra.mxu1 %v3526_v63  ;;  %v3603_v0 = vpack.c.bf16 %v551_v52, %v550_v50  ;;  %v3627_v11 = vadd.f32 %v3447_v18, %v3554_v20  ;;  %v2523_v19 = vcombine.low %v857_v10, %v3466_v27  ;;  %vm811_vm9 = vcmp.ne.s32.totalorder %v605_v2, 0  ;;  %v3216_v50 = vld [vmem:[%s3952_s5 + $0x80] sm:$0xff]  }
  0x32   : > { %2986 = vmatprep.subr.bf16.mxu1 %v3205_v41  ;;  %v3605_v63 = vpack.c.bf16 %v553_v54, %v552_v53  ;;  %v961_v20 = vor.u32 %v960_v56, %v956_v5  ;;  %vm847_vm12 = vmpackc.low %vm811_vm9, %vm811_vm9  ;;  %v554_v61 = vmax.f32 %v3557_v21, 0.0  ;;  %v3211_v5 = vld [vmem:[%s3952_s5 + $0xd8] sm:$0xff]   ;;  %v569_v37 = vadd.s32 64, %v3436_v17  ;;  %v3215_v53 = vld [vmem:[%s3952_s5 + $0xc8] sm:$0xff]  }
  0x33   : > { %2932 = vmatprep.mubr.bf16.mxu0 %v3603_v0  ;;  %v803_v9 = vsel %vm3594_vm4, %v3603_v0, 0  ;;  %vm886_vm10 = vcmp.ne.s16.totalorder %v2523_v19, 0  ;;  %v859_v29 = vsel %vm847_vm12, 65537, %v3299_v26  ;;  %v555_v36 = vmax.f32 %v3627_v11, 0.0  ;;  %v3219_v19 = vld [vmem:[%s3952_s5 + $0x178] sm:$0xff]  }
  0x34   : > { %2963 = vmatpush3.bf16.msra.mxu0 %v3204_v7  ;;  %v3615_v7 = vadd.f32 %v3447_v18, %v3546_v12  ;;  %v914_v12 = vshrl.u32 %v803_v9, 16  ;;  %v917_v13 = vshll.u32 %v803_v9, 16  ;;  %v804_v15 = vsel %vm798_vm7, %v3605_v63, 0 }
  0x35   : > { %2964 = vmatprep.subr.bf16.mxu0 %v3206_v34  ;;  %2987 = vmatpush3.bf16.msra.mxu1 %v3205_v41  ;;  %v922_v22 = vshrl.u32 %v804_v15, 16  ;;  %v925_v23 = vshll.u32 %v804_v15, 16  ;;  %v619_v18 = vand.u32 15, %v567_v3  ;;  %v892_v28 = vsel %vm886_vm10, %v3530_v6, 0  ;;  %v3214_v41 = vld [vmem:[%s3952_s5 + $0x88] sm:$0xff]  }
  0x36   : > { %2988 = vmatprep.subr.bf16.mxu1 %v3207_v57  ;;  %v916_v24 = vrot.slane %v914_v12, 7  ;;  %v963_v31 = vshll.u32 %v892_v28, 16  ;;  %v2524_v32 = vcombine.low %v859_v29, %v3466_v27  ;;  %v633_v43 = vand.u32 15, %v569_v37 }
  0x37   : > { %2933 = vmatmul.mubr.bf16.gmra.mxu0 %v3605_v63  ;;  %v3637_v25 = vrot.slane %v922_v22, 7  ;;  %vm813_vm13 = vcmp.ne.s32.totalorder %v619_v18, 0  ;;  %v967_v51 = vshrl.u32 %v892_v28, 16  ;;  %v3678_v52 = vpack.c.bf16 %v555_v36, %v554_v61  ;;  %v3224_v61 = vld [vmem:[%s3952_s5 + $0x120] sm:$0xff]  }
  0x38   : > { %2965 = vmatpush3.bf16.msra.mxu0 %v3206_v34  ;;  %v919_v30 = vor.u32 %v917_v13, %v916_v24  ;;  %vm849_vm14 = vmpackc.low %vm813_vm13, %vm813_vm13  ;;  %v965_v21 = vrot.slane %v963_v31, 1  ;;  %vm887_vm15 = vcmp.ne.s16.totalorder %v2524_v32, 0  ;;  %vm3670_vm1 = vcmp.ne.s32.totalorder %v633_v43, 0  ;;  %v3220_v13 = vld [vmem:[%s3952_s5 + $0x130] sm:$0xff]  }
  0x39   : > { %2966 = vmatprep.subr.bf16.mxu0 %v3208_v45  ;;  %2989 = vmatpush3.bf16.msra.mxu1 %v3207_v57  ;;  %v927_v34 = vor.u32 %v925_v23, %v3637_v25  ;;  %v861_v35 = vsel %vm849_vm14, 65537, %v3299_v26  ;;  %v893_v42 = vsel %vm887_vm15, %v3603_v0, 0  ;;  %vm851_vm2 = vmpackc.low %vm3670_vm1, %vm3670_vm1  ;;  %v503_v22 = vmax.f32 %v3611_v4, 0.0 }
  0x3a   : > { %2990 = vmatprep.subr.bf16.mxu1 %v3209_v8  ;;  %v3652_v38 = vsel %vm897_vm3, %v3562_v33, %v919_v30  ;;  %v2525_v39 = vcombine.low %v861_v35, %v3466_v27  ;;  %v570_v33 = vadd.s32 72, %v3436_v17  ;;  %v971_v46 = vshll.u32 %v893_v42, 16 }
  0x3b   : > { %2956 = vmatprep.mubr.bf16.mxu1 %v3652_v38  ;;  %v3657_v40 = vsel %vm897_vm3, %v916_v24, %v927_v34  ;;  %v975_v54 = vshrl.u32 %v893_v42, 16  ;;  %v863_v56 = vsel %vm851_vm2, 65537, %v3299_v26  ;;  %v969_v60 = vor.u32 %v967_v51, %v965_v21  ;;  %v3222_v24 = vld [vmem:[%s3952_s5 + $0x128] sm:$0xff]   ;;  %v3226_v42 = vld [vmem:[%s3952_s5 + $0x118] sm:$0xff]  }
  0x3c   : > { %2967 = vmatpush3.bf16.msra.mxu0 %v3208_v45  ;;  %v966_v45 = vsel %vm954_vm11, %v961_v20, %v965_v21  ;;  %vm888_vm0 = vcmp.ne.s16.totalorder %v2525_v39, 0  ;;  %2957 = vmatmul.mubr.bf16.gmra.mxu1 %v3657_v40  ;;  %v640_v48 = vand.u32 15, %v570_v33  ;;  %v2526_v57 = vcombine.low %v863_v56, %v3466_v27  ;;  %v3231_v56 = vld [vmem:[%s3952_s5 + $0x148] sm:$0xff]  }
  0x3d   : > { %2968 = vmatprep.subr.bf16.mxu0 %v3210_v62  ;;  %2991 = vmatpush3.bf16.msra.mxu1 %v3209_v8  ;;  %v894_v14 = vsel %vm888_vm0, %v3605_v63, 0  ;;  %v973_v58 = vrot.slane %v971_v46, 1  ;;  %v3217_v8 = vld [vmem:[%s3952_s5 + $0xc0] sm:$0xff]   ;;  %v504_v20 = vmax.f32 %v3615_v7, 0.0  ;;  %v571_v28 = vadd.s32 80, %v3436_v17  ;;  %v3221_v7 = vld [vmem:[%s3952_s5 + $0x170] sm:$0xff]  }
  0x3e   : > { %2992 = vmatprep.subr.bf16.mxu1 %v3211_v5  ;;  %2976 = vmatprep.mubr.bf16.mxu0 %v966_v45  ;;  %v979_v55 = vshll.u32 %v894_v14, 16  ;;  %vm726_vm4 = vcmp.ne.s32.totalorder %v640_v48, 15  ;;  %vm889_vm6 = vcmp.ne.s16.totalorder %v2526_v57, 0  ;;  %v983_v11 = vshrl.u32 %v894_v14, 16  ;;  %v3227_v46 = vld [vmem:[%s3952_s5 + $0x158] sm:$0xff]   ;;  %v3230_v48 = vld [vmem:[%s3952_s5 + $0x108] sm:$0xff]  }
  0x3f   : > { %3000 = vmatprep.mubr.bf16.mxu1 %v3586_v49  ;;  %vm762_vm5 = vmpackc.low %vm726_vm4, %vm726_vm4  ;;  %v3218_v49 = vld [vmem:[%s3952_s5 + $0x138] sm:$0xff]   ;;  %v977_v1 = vor.u32 %v975_v54, %v973_v58  ;;  %v3701_v3 = vsel %vm889_vm6, %v3678_v52, 0  ;;  %v3708_v10 = vsel %vm954_vm11, %v969_v60, %v973_v58  ;;  %v3732_v4 = vpack.c.bf16 %v504_v20, %v503_v22  ;;  %v3233_v58 = vld [vmem:[%s3952_s5 + $0x140] sm:$0xff]  }
  0x40   : > { %2969 = vmatpush3.bf16.msra.mxu0 %v3210_v62  ;;  %v774_v59 = vsel %vm762_vm5, 65537, %v3299_v26  ;;  %v981_v2 = vrot.slane %v979_v55, 1  ;;  %v987_v12 = vshll.u32 %v3701_v3, 16  ;;  %v647_v31 = vand.u32 15, %v571_v28  ;;  %v3234_v57 = vld [vmem:[%s3952_s5 + $0x1b8] sm:$0xff]   ;;  %v3251_v28 = vld [vmem:[%s3952_s5 + $0x230] sm:$0xff]  }
  0x41   : > { %2970 = vmatprep.subr.bf16.mxu0 %v3212_v16  ;;  %2993 = vmatpush3.bf16.msra.mxu1 %v3211_v5  ;;  %v2520_v62 = vcombine.low %v3466_v27, %v774_v59  ;;  %v513_v5 = vstv %s512_s9  ;;  %v572_v34 = vadd.s32 88, %v3436_v17  ;;  %v3223_v17 = vld [vmem:[%s3952_s5 + $0x168] sm:$0xff]   ;;  %vm1008_vm0 = vcmask 1047552   ;;  %v3236_v59 = vld [vmem:[%s3952_s5 + $0x1b0] sm:$0xff]   ;;  %v3235_v60 = vld [vmem:[%s3952_s5 + $0x1f8] sm:$0xff]  }
  0x42   : > { %2994 = vmatprep.subr.bf16.mxu1 %v3213_v44  ;;  %v3715_v15 = vsel %vm954_vm11, %v977_v1, %v981_v2  ;;  %v985_v23 = vor.u32 %v983_v11, %v981_v2  ;;  %v3723_v18 = vrot.slane %v987_v12, 1  ;;  %vm3748_vm9 = vcmp.eq.s32.totalorder %v513_v5, 1  ;;  %vm3798_vm2 = vmand %vm1008_vm0, %vm954_vm11  ;;  %v3237_v1 = vld [vmem:[%s3952_s5 + $0x1f0] sm:$0xff]   ;;  %v3240_v2 = vld [vmem:[%s3952_s5 + $0x1a0] sm:$0xff]  }
  0x43   : > { %vm799_vm7 = vcmp.ne.s16.totalorder %v2520_v62, 0  ;;  %vm817_vm10 = vcmp.ne.s32.totalorder %v647_v31, 0  ;;  %v515_v21 = vsel %vm3748_vm9, %v3732_v4, 0  ;;  %v991_v62 = vshrl.u32 %v3701_v3, 16  ;;  %v3239_v3 = vld [vmem:[%s3952_s5 + $0x1e8] sm:$0xff]   ;;  %v3241_v11 = vld [vmem:[%s3952_s5 + $0x1e0] sm:$0xff]  }
  0x44   : > { %2971 = vmatpush3.bf16.msra.mxu0 %v3212_v16  ;;  %v805_v9 = vsel %vm799_vm7, %v3678_v52, 0  ;;  %v3741_v32 = vsel %vm954_vm11, %v985_v23, %v3723_v18  ;;  %vm853_vm12 = vmpackc.low %vm817_vm10, %vm817_vm10  ;;  %v3243_v12 = vld [vmem:[%s3952_s5 + $0x1d8] sm:$0xff]  }
  0x45   : > { %2972 = vmatprep.subr.bf16.mxu0 %v3214_v41  ;;  %2995 = vmatpush3.bf16.msra.mxu1 %v3213_v44  ;;  %v930_v16 = vshrl.u32 %v805_v9, 16  ;;  %v933_v30 = vshll.u32 %v805_v9, 16  ;;  %v865_v37 = vsel %vm853_vm12, 65537, %v3299_v26  ;;  %v3228_v44 = vld [vmem:[%s3952_s5 + $0x110] sm:$0xff]   ;;  %v3242_v9 = vld [vmem:[%s3952_s5 + $0x198] sm:$0xff]  }
  0x46   : > { %2996 = vmatprep.subr.bf16.mxu1 %v3215_v53  ;;  %v2527_v39 = vcombine.low %v865_v37, %v3466_v27  ;;  %v3250_v23 = vld [vmem:[%s3952_s5 + $0x238] sm:$0xff]  }
  0x47   : > { %v3730_v29 = vrot.slane %v930_v16, 7  ;;  %v3245_v16 = vld [vmem:[%s3952_s5 + $0x1d0] sm:$0xff]  }
  0x48   : > { %2973 = vmatpush3.bf16.msra.mxu0 %v3214_v41  ;;  %v654_v41 = vand.u32 15, %v572_v34  ;;  %vm890_vm13 = vcmp.ne.s16.totalorder %v2527_v39, 0 }
  0x49   : > { %2974 = vmatprep.subr.bf16.mxu0 %v3216_v50  ;;  %2997 = vmatpush3.bf16.msra.mxu1 %v3215_v53  ;;  %v935_v36 = vor.u32 %v933_v30, %v3730_v29  ;;  %v896_v33 = vsel %vm890_vm13, %v515_v21, 0  ;;  %v3229_v53 = vld [vmem:[%s3952_s5 + $0x150] sm:$0xff]  }
  0x4a   : > { %2998 = vmatprep.subr.bf16.mxu1 %v3217_v8  ;;  %v995_v45 = vshll.u32 %v896_v33, 16  ;;  %vm728_vm14 = vcmp.ne.s32.totalorder %v654_v41, 15 }
  0x4b   : > { %v3769_v43 = vsel %vm897_vm3, %v3637_v25, %v935_v36  ;;  %v999_v25 = vshrl.u32 %v896_v33, 16  ;;  %vm764_vm15 = vmpackc.low %vm728_vm14, %vm728_vm14 }
  0x4c   : > { %2975 = vmatpush3.bf16.msra.mxu0 %v3216_v50  ;;  %v997_v14 = vrot.slane %v995_v45, 1  ;;  %v776_v47 = vsel %vm764_vm15, 65537, %v3299_v26  ;;  %v3232_v26 = vld [vmem:[%s3952_s5 + $0x100] sm:$0xff]  }
  0x4d   : > { %3008 = vmatprep.subr.bf16.mxu0 %v3218_v49  ;;  %2999 = vmatpush3.bf16.msra.mxu1 %v3217_v8  ;;  %v2521_v50 = vcombine.low %v3466_v27, %v776_v47  ;;  %v993_v8 = vor.u32 %v991_v62, %v3723_v18  ;;  %v3249_v18 = vld [vmem:[%s3952_s5 + $0x1c0] sm:$0xff]  }
  0x4e   : > { %3032 = vmatprep.subr.bf16.mxu1 %v3219_v19  ;;  %v3787_v51 = vor.u32 %v999_v25, %v997_v14 }
  0x4f   : > { %2977 = vmatmul.mubr.bf16.vlgmr.msra.gmra.mxu0 %v3708_v10  ;;  %vm800_vm1 = vcmp.ne.s16.totalorder %v2521_v50, 0 }
  0x50   : > { %3009 = vmatpush3.bf16.msra.mxu0 %v3218_v49  ;;  %2980 = vmatprep.mubr.bf16.mxu0 %v3715_v15  ;;  %v3795_v54 = vsel %vm800_vm1, %v515_v21, 0  ;;  %v1010_v55 = vsel %vm3798_vm2, %v3787_v51, 0  ;;  %v3238_v49 = vld [vmem:[%s3952_s5 + $0x1a8] sm:$0xff]  }
  0x51   : > { %3010 = vmatprep.subr.bf16.mxu0 %v3220_v13  ;;  %3001 = vmatmul.mubr.bf16.vlgmr.msra.gmra.mxu1 %v3652_v38  ;;  %v938_v22 = vshrl.u32 %v3795_v54, 16 }
  0x52   : > { %3033 = vmatpush3.bf16.msra.mxu1 %v3219_v19  ;;  %3004 = vmatprep.mubr.bf16.mxu1 %v3657_v40  ;;  %v3247_v19 = vld [vmem:[%s3952_s5 + $0x1c8] sm:$0xff]  }
  0x53   : > { %3034 = vmatprep.subr.bf16.mxu1 %v3221_v7  ;;  %v940_v20 = vrot.slane %v938_v22, 7 }
  0x54   : > { %3011 = vmatpush3.bf16.msra.mxu0 %v3220_v13  ;;  %v3246_v13 = vld [vmem:[%s3952_s5 + $0x188] sm:$0xff]  }
  0x55   : > { %3012 = vmatprep.subr.bf16.mxu0 %v3222_v24 }
  0x56   : > { %3035 = vmatpush3.bf16.msra.mxu1 %v3221_v7  ;;  %v3252_v7 = vld [vmem:[%s3952_s5 + $0x228] sm:$0xff]  }
  0x57   : > { %2981 = vmatmul.mubr.bf16.gmra.mxu0 %v3741_v32  ;;  %3036 = vmatprep.subr.bf16.mxu1 %v3223_v17 }
  0x58   : > { %3013 = vmatpush3.bf16.msra.mxu0 %v3222_v24  ;;  %3024 = vmatprep.mubr.bf16.mxu0 %v3530_v6  ;;  %v3225_v6 = vld [vmem:[%s3952_s5 + $0x160] sm:$0xff]   ;;  %v941_v24 = vshll.u32 %v3795_v54, 16 }
  0x59   : > { %3014 = vmatprep.subr.bf16.mxu0 %v3224_v61  ;;  %3005 = vmatmul.mubr.bf16.gmra.mxu1 %v3769_v43 }
  0x5a   : > { %3037 = vmatpush3.bf16.msra.mxu1 %v3223_v17  ;;  %3048 = vmatprep.mubr.bf16.mxu1 %v3708_v10  ;;  %v3844_v10 = vsel %vm954_vm11, %v993_v8, %v997_v14  ;;  %v943_v30 = vor.u32 %v941_v24, %v940_v20 }
  0x5b   : > { %3038 = vmatprep.subr.bf16.mxu1 %v3225_v6 }
  0x5c   : > { %3015 = vmatpush3.bf16.msra.mxu0 %v3224_v61  ;;  %v944_v31 = vsel %vm897_vm3, %v3730_v29, %v943_v30  ;;  %v3254_v29 = vld [vmem:[%s3952_s5 + $0x218] sm:$0xff]  }
  0x5d   : > { %3016 = vmatprep.subr.bf16.mxu0 %v3226_v42 }
  0x5e   : > { %3039 = vmatpush3.bf16.msra.mxu1 %v3225_v6 }
  0x5f   : > { %3040 = vmatprep.subr.bf16.mxu1 %v3227_v46 }
  0x60   : > { %3017 = vmatpush3.bf16.msra.mxu0 %v3226_v42 }
  0x61   : > { %3018 = vmatprep.subr.bf16.mxu0 %v3228_v44 }
  0x62   : > { %3041 = vmatpush3.bf16.msra.mxu1 %v3227_v46 }
  0x63   : > { %3042 = vmatprep.subr.bf16.mxu1 %v3229_v53 }
  0x64   : > { %3019 = vmatpush3.bf16.msra.mxu0 %v3228_v44 }
  0x65   : > { %3020 = vmatprep.subr.bf16.mxu0 %v3230_v48 }
  0x66   : > { %3043 = vmatpush3.bf16.msra.mxu1 %v3229_v53 }
  0x67   : > { %3044 = vmatprep.subr.bf16.mxu1 %v3231_v56 }
  0x68   : > { %3021 = vmatpush3.bf16.msra.mxu0 %v3230_v48 }
  0x69   : > { %3022 = vmatprep.subr.bf16.mxu0 %v3232_v26 }
  0x6a   : > { %3045 = vmatpush3.bf16.msra.mxu1 %v3231_v56 }
  0x6b   : > { %3046 = vmatprep.subr.bf16.mxu1 %v3233_v58 }
  0x6c   : > { %3023 = vmatpush3.bf16.msra.mxu0 %v3232_v26 }
  0x6d   : > { %3056 = vmatprep.subr.bf16.mxu0 %v3234_v57 }
  0x6e   : > { %3047 = vmatpush3.bf16.msra.mxu1 %v3233_v58 }
  0x6f   : > { %3025 = vmatmul.mubr.bf16.vlgmr.msra.gmra.mxu0 %v3603_v0  ;;  %3080 = vmatprep.subr.bf16.mxu1 %v3235_v60 }
  0x70   : > { %3057 = vmatpush3.bf16.msra.mxu0 %v3234_v57  ;;  %3028 = vmatprep.mubr.bf16.mxu0 %v3605_v63 }
  0x71   : > { %3058 = vmatprep.subr.bf16.mxu0 %v3236_v59  ;;  %3049 = vmatmul.mubr.bf16.vlgmr.msra.gmra.mxu1 %v3715_v15 }
  0x72   : > { %3081 = vmatpush3.bf16.msra.mxu1 %v3235_v60  ;;  %3052 = vmatprep.mubr.bf16.mxu1 %v3741_v32 }
  0x73   : > { %3082 = vmatprep.subr.bf16.mxu1 %v3237_v1 }
  0x74   : > { %3059 = vmatpush3.bf16.msra.mxu0 %v3236_v59 }
  0x75   : > { %3060 = vmatprep.subr.bf16.mxu0 %v3238_v49 }
  0x76   : > { %3083 = vmatpush3.bf16.msra.mxu1 %v3237_v1 }
  0x77   : > { %3029 = vmatmul.mubr.bf16.gmra.mxu0 %v3678_v52  ;;  %3084 = vmatprep.subr.bf16.mxu1 %v3239_v3 }
  0x78   : > { %3061 = vmatpush3.bf16.msra.mxu0 %v3238_v49  ;;  %3072 = vmatprep.mubr.bf16.mxu0 %v3652_v38  ;;  %v3244_v38 = vld [vmem:[%s3952_s5 + $0x190] sm:$0xff]  }
  0x79   : > { %3062 = vmatprep.subr.bf16.mxu0 %v3240_v2  ;;  %3053 = vmatmul.mubr.bf16.gmra.mxu1 %v3844_v10 }
  0x7a   : > { %3085 = vmatpush3.bf16.msra.mxu1 %v3239_v3  ;;  %3096 = vmatprep.mubr.bf16.mxu1 %v3603_v0  ;;  %v3248_v0 = vld [vmem:[%s3952_s5 + $0x180] sm:$0xff]  }
  0x7b   : > { %3086 = vmatprep.subr.bf16.mxu1 %v3241_v11 }
  0x7c   : > { %3063 = vmatpush3.bf16.msra.mxu0 %v3240_v2 }
  0x7d   : > { %3064 = vmatprep.subr.bf16.mxu0 %v3242_v9 }
  0x7e   : > { %3087 = vmatpush3.bf16.msra.mxu1 %v3241_v11 }
  0x7f   : > { %3088 = vmatprep.subr.bf16.mxu1 %v3243_v12 }
  0x80   : > { %3065 = vmatpush3.bf16.msra.mxu0 %v3242_v9 }
  0x81   : > { %3066 = vmatprep.subr.bf16.mxu0 %v3244_v38 }
  0x82   : > { %3089 = vmatpush3.bf16.msra.mxu1 %v3243_v12 }
  0x83   : > { %3090 = vmatprep.subr.bf16.mxu1 %v3245_v16 }
  0x84   : > { %3067 = vmatpush3.bf16.msra.mxu0 %v3244_v38 }
  0x85   : > { %3068 = vmatprep.subr.bf16.mxu0 %v3246_v13 }
  0x86   : > { %3091 = vmatpush3.bf16.msra.mxu1 %v3245_v16 }
  0x87   : > { %3092 = vmatprep.subr.bf16.mxu1 %v3247_v19 }
  0x88   : > { %3069 = vmatpush3.bf16.msra.mxu0 %v3246_v13 }
  0x89   : > { %3070 = vmatprep.subr.bf16.mxu0 %v3248_v0 }
  0x8a   : > { %3093 = vmatpush3.bf16.msra.mxu1 %v3247_v19 }
  0x8b   : > { %3094 = vmatprep.subr.bf16.mxu1 %v3249_v18 }
  0x8c   : > { %3071 = vmatpush3.bf16.msra.mxu0 %v3248_v0 }
  0x8d   : > { %3104 = vmatprep.subr.bf16.mxu0 %v3250_v23 }
  0x8e   : > { %3095 = vmatpush3.bf16.msra.mxu1 %v3249_v18 }
  0x8f   : > { %3073 = vmatmul.mubr.bf16.vlgmr.msra.gmra.mxu0 %v3657_v40  ;;  %3128 = vmatprep.subr.bf16.mxu1 %v3250_v23  ;;  %v3253_v40 = vld [vmem:[%s3952_s5 + $0x220] sm:$0xff]  }
  0x90   : > { %3105 = vmatpush3.bf16.msra.mxu0 %v3250_v23  ;;  %3076 = vmatprep.mubr.bf16.mxu0 %v3769_v43 }
  0x91   : > { %3106 = vmatprep.subr.bf16.mxu0 %v3251_v28  ;;  %3097 = vmatmul.mubr.bf16.vlgmr.msra.gmra.mxu1 %v3605_v63  ;;  %v3255_v63 = vld [vmem:[%s3952_s5 + $0x210] sm:$0xff]  }
  0x92   : > { %3136 = vmatpush3.bf16.msra.mxu1 %v3250_v23  ;;  %3100 = vmatprep.mubr.bf16.mxu1 %v3678_v52  ;;  %v3256_v52 = vld [vmem:[%s3952_s5 + $0x208] sm:$0xff]  }
  0x93   : > { %3129 = vmatprep.subr.bf16.mxu1 %v3251_v28 }
  0x94   : > { %3107 = vmatpush3.bf16.msra.mxu0 %v3251_v28 }
  0x95   : > { %3108 = vmatprep.subr.bf16.mxu0 %v3252_v7 }
  0x96   : > { %3137 = vmatpush3.bf16.msra.mxu1 %v3251_v28 }
  0x97   : > { %3077 = vmatmul.mubr.bf16.gmra.mxu0 %v944_v31  ;;  %3130 = vmatprep.subr.bf16.mxu1 %v3252_v7 }
  0x98   : > { %3109 = vmatpush3.bf16.msra.mxu0 %v3252_v7  ;;  %3120 = vmatprep.mubr.bf16.mxu0 %v3715_v15  ;;  %v3257_v15 = vld [vmem:[%s3952_s5 + $0x200] sm:$0xff]  }
  0x99   : > { %3110 = vmatprep.subr.bf16.mxu0 %v3253_v40  ;;  %3101 = vmatmul.mubr.msk.bf16.gmra.mxu1 %vm3748_vm9, %v3732_v4 }
  0x9a   : > { %3138 = vmatpush3.bf16.msra.mxu1 %v3252_v7  ;;  %3124 = vmatprep.mubr.bf16.mxu1 %v3844_v10 }
  0x9b   : > { %3131 = vmatprep.subr.bf16.mxu1 %v3253_v40 }
  0x9c   : > { %3111 = vmatpush3.bf16.msra.mxu0 %v3253_v40 }
  0x9d   : > { %3112 = vmatprep.subr.bf16.mxu0 %v3254_v29 }
  0x9e   : > { %3139 = vmatpush3.bf16.msra.mxu1 %v3253_v40 }
  0x9f   : > { %3132 = vmatprep.subr.bf16.mxu1 %v3254_v29 }
  0xa0   : > { %3113 = vmatpush3.bf16.msra.mxu0 %v3254_v29 }
  0xa1   : > { %3114 = vmatprep.subr.bf16.mxu0 %v3255_v63 }
  0xa2   : > { %3140 = vmatpush3.bf16.msra.mxu1 %v3254_v29 }
  0xa3   : > { %3133 = vmatprep.subr.bf16.mxu1 %v3255_v63 }
  0xa4   : > { %3115 = vmatpush3.bf16.msra.mxu0 %v3255_v63 }
  0xa5   : > { %3116 = vmatprep.subr.bf16.mxu0 %v3256_v52 }
  0xa6   : > { %3141 = vmatpush3.bf16.msra.mxu1 %v3255_v63 }
  0xa7   : > { %3134 = vmatprep.subr.bf16.mxu1 %v3256_v52 }
  0xa8   : > { %3117 = vmatpush3.bf16.msra.mxu0 %v3256_v52 }
  0xa9   : > { %3118 = vmatprep.subr.bf16.mxu0 %v3257_v15 }
  0xaa   : > { %3142 = vmatpush3.bf16.msra.mxu1 %v3256_v52 }
  0xab   : > { %3135 = vmatprep.subr.bf16.mxu1 %v3257_v15 }
  0xac   : > { %3119 = vmatpush3.bf16.msra.mxu0 %v3257_v15 }
  0xae   : > { %3143 = vmatpush3.bf16.msra.mxu1 %v3257_v15 }
  0xaf   : > { %3121 = vmatmul.mubr.bf16.vlgmr.msra.gmra.mxu0 %v3741_v32 }
  0xb1   : > { %3125 = vmatmul.mubr.bf16.vlgmr.msra.gmra.mxu1 %v1010_v55 }
  0xef   : > { %v2930_v4 = vpop.f32.mrf.mxu0 }
  0xf0   : > { %v2954_v5 = vpop.f32.mrf.mxu1 }
  0xf1   : > { %v1126_v61 = vpop.f32.mrf.mxu0  ;;  %v1248_v28 = vadd.f32 %v2954_v5, %v2930_v4 }
  0xf2   : > { %v1239_v35 = vpop.f32.mrf.mxu1 }
  0xf3   : > { %v2931_v34 = vpop.f32.mrf.mxu0  ;;  %v1240_v7 = vadd.f32 %v1239_v35, %v1126_v61 }
  0xf4   : > { %v2955_v17 = vpop.f32.mrf.mxu1 }
  0xf5   : > { %v1129_v36 = vpop.f32.mrf.mxu0  ;;  %v1251_v30 = vadd.f32 %v2955_v17, %v2931_v34 }
  0xf6   : > { %v1242_v21 = vpop.f32.mrf.mxu1 }
  0xf7   : > { %v2934_v37 = vpop.f32.mrf.mxu0  ;;  %v1243_v40 = vadd.f32 %v1242_v21, %v1129_v36 }
  0xf9   : > { %v1142_v39 = vpop.f32.mrf.mxu0 }
  0xfb   : > { %v2935_v42 = vpop.f32.mrf.mxu0 }
  0xfc   : > { %v2958_v41 = vpop.f32.mrf.mxu1 }
  0xfd   : > { %v1145_v32 = vpop.f32.mrf.mxu0  ;;  %v1264_v4 = vadd.f32 %v2958_v41, %v2934_v37 }
  0xfe   : > { %v1255_v43 = vpop.f32.mrf.mxu1 }
  0xff   : > { %v1256_v61 = vadd.f32 %v1255_v43, %v1142_v39 }
 0x100   : > { %v2959_v6 = vpop.f32.mrf.mxu1 }
 0x101   : > { %v1267_v17 = vadd.f32 %v2959_v6, %v2935_v42 }
 0x102   : > { %v1258_v44 = vpop.f32.mrf.mxu1 }
 0x103   : > { %v1259_v21 = vadd.f32 %v1258_v44, %v1145_v32 }
 0x10f   : > { %v2978_v33 = vpop.f32.mrf.mxu0 }
 0x110   : > { %v1402_v29 = vadd.f32 %v2978_v33, %v1248_v28 }
 0x111   : > { %v1369_v45 = vpop.f32.mrf.mxu0  ;;  %v3002_v25 = vpop.f32.mrf.mxu1 }
 0x112   : > { %v1400_v52 = vadd.f32 %v1369_v45, %v1240_v7  ;;  %v1540_v34 = vadd.f32 %v3002_v25, %v1402_v29 }
 0x113   : > { %v2979_v46 = vpop.f32.mrf.mxu0  ;;  %v1507_v14 = vpop.f32.mrf.mxu1 }
 0x114   : > { %v1403_v63 = vadd.f32 %v2979_v46, %v1251_v30  ;;  %v1538_v36 = vadd.f32 %v1507_v14, %v1400_v52 }
 0x115   : > { %v1372_v47 = vpop.f32.mrf.mxu0  ;;  %v3003_v48 = vpop.f32.mrf.mxu1 }
 0x116   : > { %v1541_v35 = vadd.f32 %v3003_v48, %v1403_v63 }
 0x117   : > { %v2982_v50 = vpop.f32.mrf.mxu0  ;;  %v1510_v51 = vpop.f32.mrf.mxu1 }
 0x118   : > { %v1406_v28 = vadd.f32 %v2982_v50, %v1264_v4 }
 0x119   : > { %v1385_v53 = vpop.f32.mrf.mxu0  ;;  %v3006_v26 = vpop.f32.mrf.mxu1 }
 0x11a   : > { %v1544_v42 = vadd.f32 %v3006_v26, %v1406_v28 }
 0x11b   : > { %v2983_v54 = vpop.f32.mrf.mxu0  ;;  %v1523_v27 = vpop.f32.mrf.mxu1 }
 0x11c   : > { %v1407_v46 = vadd.f32 %v2983_v54, %v1267_v17 }
 0x11d   : > { %v1388_v55 = vpop.f32.mrf.mxu0  ;;  %v3007_v56 = vpop.f32.mrf.mxu1 }
 0x11e   : > { %v1545_v29 = vadd.f32 %v3007_v56, %v1407_v46 }
 0x11f   : > { %v1526_v58 = vpop.f32.mrf.mxu1 }
 0x12f   : > { %v3026_v57 = vpop.f32.mrf.mxu0 }
 0x130   : > { %v1678_v7 = vadd.f32 %v3026_v57, %v1540_v34 }
 0x131   : > { %v1645_v59 = vpop.f32.mrf.mxu0  ;;  %v3050_v60 = vpop.f32.mrf.mxu1 }
 0x132   : > { %v1676_v37 = vadd.f32 %v1645_v59, %v1538_v36  ;;  %v1816_v48 = vadd.f32 %v3050_v60, %v1678_v7 }
 0x133   : > { %v3027_v49 = vpop.f32.mrf.mxu0  ;;  %v1783_v62 = vpop.f32.mrf.mxu1 }
 0x134   : > { %v1679_v45 = vadd.f32 %v3027_v49, %v1541_v35  ;;  %v1814_v32 = vadd.f32 %v1783_v62, %v1676_v37 }
 0x135   : > { %v1648_v1 = vpop.f32.mrf.mxu0  ;;  %v3051_v2 = vpop.f32.mrf.mxu1 }
 0x136   : > { %v1817_v63 = vadd.f32 %v3051_v2, %v1679_v45 }
 0x137   : > { %v3030_v8 = vpop.f32.mrf.mxu0  ;;  %v1786_v3 = vpop.f32.mrf.mxu1 }
 0x138   : > { %v1682_v44 = vadd.f32 %v3030_v8, %v1544_v42 }
 0x139   : > { %v1661_v9 = vpop.f32.mrf.mxu0  ;;  %v3054_v10 = vpop.f32.mrf.mxu1 }
 0x13a   : > { %v1820_v26 = vadd.f32 %v3054_v10, %v1682_v44 }
 0x13b   : > { %v3031_v11 = vpop.f32.mrf.mxu0  ;;  %v3914_v38 = vpop.f32.mrf.mxu1 }
 0x13c   : > { %3970 = vst [vmem:[#allocation2_spill] sm:$0xff] %v3914_v38  ;;  %v1401_v38 = vadd.f32 %v1372_v47, %v1243_v40  ;;  %v1404_v40 = vadd.f32 %v1385_v53, %v1256_v61  ;;  %v1405_v47 = vadd.f32 %v1388_v55, %v1259_v21 }
 0x13d   : > { %v1664_v12 = vpop.f32.mrf.mxu0  ;;  %v3055_v13 = vpop.f32.mrf.mxu1 }
 0x13e   : > { %v1539_v30 = vadd.f32 %v1510_v51, %v1401_v38  ;;  %v1542_v39 = vadd.f32 %v1523_v27, %v1404_v40  ;;  %v1543_v43 = vadd.f32 %v1526_v58, %v1405_v47  ;;  %v1683_v51 = vadd.f32 %v3031_v11, %v1545_v29 }
 0x13f   : > { %v1802_v0 = vpop.f32.mrf.mxu1 }
 0x140   : > { %v1677_v6 = vadd.f32 %v1648_v1, %v1539_v30  ;;  %v1680_v49 = vadd.f32 %v1661_v9, %v1542_v39  ;;  %v1681_v53 = vadd.f32 %v1664_v12, %v1543_v43  ;;  %v1821_v56 = vadd.f32 %v3055_v13, %v1683_v51 }
 0x142   : > { %v1815_v50 = vadd.f32 %v1786_v3, %v1677_v6  ;;  %v1819_v2 = vadd.f32 %v1802_v0, %v1681_v53 }
 0x143   : > { %v3971_v58 = vld [vmem:[#allocation2_spill] sm:$0xff] }
 0x144   : > { %v1818_v62 = vadd.f32 %v3971_v58, %v1680_v49 }
 0x14f   : > { %v3074_v16 = vpop.f32.mrf.mxu0 }
 0x150   : > { %v1954_v54 = vadd.f32 %v3074_v16, %v1816_v48 }
 0x151   : > { %v1921_v19 = vpop.f32.mrf.mxu0  ;;  %v3098_v22 = vpop.f32.mrf.mxu1 }
 0x152   : > { %v1952_v55 = vadd.f32 %v1921_v19, %v1814_v32  ;;  %v2092_v60 = vadd.f32 %v3098_v22, %v1954_v54 }
 0x153   : > { %v3075_v23 = vpop.f32.mrf.mxu0  ;;  %v2059_v18 = vpop.f32.mrf.mxu1 }
 0x154   : > { %v1955_v57 = vadd.f32 %v3075_v23, %v1817_v63  ;;  %v2090_v8 = vadd.f32 %v2059_v18, %v1952_v55 }
 0x155   : > { %v1924_v20 = vpop.f32.mrf.mxu0  ;;  %v3099_v24 = vpop.f32.mrf.mxu1 }
 0x156   : > { %v1953_v1 = vadd.f32 %v1924_v20, %v1815_v50  ;;  %v2093_v27 = vadd.f32 %v3099_v24, %v1955_v57 }
 0x157   : > { %v3078_v31 = vpop.f32.mrf.mxu0  ;;  %v2062_v15 = vpop.f32.mrf.mxu1 }
 0x158   : > { %v1958_v3 = vadd.f32 %v3078_v31, %v1820_v26  ;;  %v2091_v23 = vadd.f32 %v2062_v15, %v1953_v1 }
 0x159   : > { %v1937_v5 = vpop.f32.mrf.mxu0  ;;  %v3102_v33 = vpop.f32.mrf.mxu1 }
 0x15a   : > { %v1956_v4 = vadd.f32 %v1937_v5, %v1818_v62  ;;  %v2096_v24 = vadd.f32 %v3102_v33, %v1958_v3 }
 0x15b   : > { %v3079_v41 = vpop.f32.mrf.mxu0  ;;  %v2075_v25 = vpop.f32.mrf.mxu1 }
 0x15c   : > { %v1959_v9 = vadd.f32 %v3079_v41, %v1821_v56  ;;  %v2094_v5 = vadd.f32 %v2075_v25, %v1956_v4 }
 0x15d   : > { %v1940_v14 = vpop.f32.mrf.mxu0  ;;  %v3103_v59 = vpop.f32.mrf.mxu1 }
 0x15e   : > { %v1957_v13 = vadd.f32 %v1940_v14, %v1819_v2  ;;  %v2097_v31 = vadd.f32 %v3103_v59, %v1959_v9 }
 0x15f   : > { %v2078_v11 = vpop.f32.mrf.mxu1 }
 0x160   : > { %v2095_v36 = vadd.f32 %v2078_v11, %v1957_v13 }
 0x16f   : > { %v3122_v38 = vpop.f32.mrf.mxu0 }
 0x170   : > { %v2230_v12 = vadd.f32 %v3122_v38, %v2092_v60 }
 0x171   : > { %v2197_v52 = vpop.f32.mrf.mxu0  ;;  %v3126_v17 = vpop.f32.mrf.mxu1 }
 0x172   : > { %v2228_v20 = vadd.f32 %v2197_v52, %v2090_v8  ;;  %v2234_v28 = vadd.f32 %v3126_v17, %v2096_v24  ;;  %v2291_v7 = vmul.f32 %v2230_v12, %v2230_v12 }
 0x173   : > { %v3123_v16 = vpop.f32.mrf.mxu0  ;;  %v2213_v18 = vpop.f32.mrf.mxu1 }
 0x174   : > { %v2231_v19 = vadd.f32 %v3123_v16, %v2093_v27  ;;  %v2289_v35 = vmul.f32 %v2228_v20, %v2228_v20  ;;  %v2232_v45 = vadd.f32 %v2213_v18, %v2094_v5  ;;  %v2295_v14 = vmul.f32 %v2234_v28, %v2234_v28 }
 0x175   : > { %v2200_v10 = vpop.f32.mrf.mxu0  ;;  %v3127_v61 = vpop.f32.mrf.mxu1 }
 0x176   : > { %v2786_v0 = vpack.c.bf16 %v2231_v19, %v2230_v12  ;;  %v2229_v22 = vadd.f32 %v2200_v10, %v2091_v23  ;;  %v2235_v30 = vadd.f32 %v3127_v61, %v2097_v31  ;;  %v2292_v6 = vmul.f32 %v2231_v19, %v2231_v19 }
 0x177   : > { %v2216_v47 = vpop.f32.mrf.mxu1  ;;  %v2293_v48 = vmul.f32 %v2232_v45, %v2232_v45 }
 0x178   : > { %2801 = vst [vmem:[%s3921_s17 + $0x8] sm:$0xff] %v2786_v0   ;;  %v2781_v15 = vpack.c.bf16 %v2229_v22, %v2228_v20  ;;  %v2276_v34 = vadd.f32 %v2229_v22, %v2228_v20  ;;  %v2290_v21 = vmul.f32 %v2229_v22, %v2229_v22  ;;  %v2796_v33 = vpack.c.bf16 %v2235_v30, %v2234_v28 }
 0x179   : > { %v2233_v37 = vadd.f32 %v2216_v47, %v2095_v36  ;;  %v2296_v54 = vmul.f32 %v2235_v30, %v2235_v30 }
 0x17a   : > { %2782 = vst [vmem:[%s3921_s17] sm:$0xff] %v2781_v15   ;;  %v2277_v46 = vadd.f32 %v2276_v34, %v2230_v12  ;;  %v2297_v40 = vadd.f32 %v2290_v21, %v2289_v35  ;;  %2803 = vst [vmem:[%s3921_s17 + $0x18] sm:$0xff] %v2796_v33  }
 0x17b   : > { %v2791_v25 = vpack.c.bf16 %v2233_v37, %v2232_v45  ;;  %v2294_v43 = vmul.f32 %v2233_v37, %v2233_v37 }
 0x17c   : > { %v2278_v41 = vadd.f32 %v2277_v46, %v2231_v19  ;;  %v2298_v42 = vadd.f32 %v2297_v40, %v2291_v7 }
 0x17d   : > { %2802 = vst [vmem:[%s3921_s17 + $0x10] sm:$0xff] %v2791_v25  }
 0x17e   : > { %v2279_v29 = vadd.f32 %v2278_v41, %v2232_v45  ;;  %v2299_v63 = vadd.f32 %v2298_v42, %v2292_v6 }
 0x180   : > { %v2280_v39 = vadd.f32 %v2279_v29, %v2233_v37  ;;  %v2300_v32 = vadd.f32 %v2299_v63, %v2293_v48 }
 0x182   : > { %v2281_v44 = vadd.f32 %v2280_v39, %v2234_v28  ;;  %v2301_v50 = vadd.f32 %v2300_v32, %v2294_v43 }
 0x184   : > { %v2282_v51 = vadd.f32 %v2281_v44, %v2235_v30  ;;  %v2302_v57 = vadd.f32 %v2301_v50, %v2295_v14 }
 0x186   : > { %v2283_v49 = vrot.slane %v2282_v51, 4  ;;  %v2303_v53 = vadd.f32 %v2302_v57, %v2296_v54 }
 0x188   : > { %v2284_v55 = vadd.f32 %v2283_v49, %v2282_v51  ;;  %v2304_v59 = vrot.slane %v2303_v53, 4 }
 0x18a   : > { %v2285_v38 = vrot.slane %v2284_v55, 2  ;;  %v2305_v1 = vadd.f32 %v2304_v59, %v2303_v53 }
 0x18c   : > { %v2286_v26 = vadd.f32 %v2285_v38, %v2284_v55  ;;  %v2306_v52 = vrot.slane %v2305_v1, 2 }
 0x18e   : > { %v2287_v56 = vrot.slane %v2286_v26, 1  ;;  %v2307_v60 = vadd.f32 %v2306_v52, %v2305_v1 }
 0x190   : > { %v2308_v27 = vrot.slane %v2307_v60, 1  ;;  %v2288_v58 = vadd.f32 %v2287_v56, %v2286_v26 }
 0x192   : > { %v2309_v62 = vadd.f32 %v2308_v27, %v2307_v60 }
 0x194   : > { %v2311_v2 = vsel %vm951_vm8, %v2288_v58, %v2309_v62 }
 0x195   : > { %2312 = vst [vmem:[%s466_s20] sm:$0x3] %v2311_v2 }
 0x196 PF: > { %s18_s28 = sadd.s32 1, %s3296_s28   ;;  %s3972_s24 = smov %s3288_s26 }
 0x197   : > { %p15_p13 = scmp.ge.s32.totalorder %s18_s28, 10   ;;  %s3973_s25 = smov %s3292_s27 }
 0x198   : > { %s3974_s26 = smov %s3977_s29  ;;  %s3975_s27 = smov %s3981_s30 }
 0x199   :  { %17 = sbr.rel (!%p15_p13) target bundleno = 3 (0x3), region = 100 }

// kernel: basic_residual_block.2
= control target key start
LH: loop header
LB: loop body
LE: loop exit
PB: predicated region body
PF: predicated region fallthrough
CT: control target
= control target key end

     0   :  { %s3225_s18 = smov 0   ;;  %s3227_s19 = smov 0   ;;  %s3773_s0 = inlined_call_operand.vmem [shape: bf16[2,256,128], index: 0, kind: input, shape index: {}, may-alias: {0,1,2}]   ;;  %s3774_s1 = inlined_call_operand.vmem [shape: bf16[2,256,128], index: 1, kind: input, shape index: {}, may-alias: {0,1,2}]   ;;  %s3775_s2 = inlined_call_operand.vmem [shape: bf16[2,256,128], index: 2, kind: input, shape index: {}, may-alias: {0,1,2}]   ;;  %s3776_s3 = inlined_call_operand.vmem [shape: bf16[9,128,128], index: 3, kind: input, shape index: {}]   ;;  %s3777_s4 = inlined_call_operand.vmem [shape: bf16[2,256,128], index: 4, kind: output, shape index: {0}]   ;;  %s3778_s5 = inlined_call_operand.vmem [shape: f32[2,4,2,128], index: 5, kind: output, shape index: {1}]  }
   0x1   :  { %s3229_s20 = smov 0   ;;  %s3231_s21 = smov 0  }
   0x2   :  { %s3233_s22 = smov 0  }
   0x3 LB: > { %s25_s23 = sadd.s32 1, %s3183_s20  ;;  %s28_s24 = sadd.s32 1, %s3187_s21  ;;  %s3191_s22 = sphi %s3233_s22, %s16_s22   ;;  %s3187_s21 = sphi %s3231_s21, %s3800_s21   ;;  %s3183_s20 = sphi %s3229_s20, %s3799_s20   ;;  %s3179_s19 = sphi %s3227_s19, %s3798_s19   ;;  %s3175_s18 = sphi %s3225_s18, %s3797_s18  }
   0x4   : > { %p26_p0 = scmp.ge.s32.totalorder %s25_s23, 4  ;;  %p2412_p1 = scmp.ge.s32.totalorder %s3191_s22, 1 }
   0x5   : > { %p279_p2 = scmp.lt.s32.totalorder %s3191_s22, 9 }
   0x6   : > { %s3802_s23 = smov (%p26_p0, %s25_s23), 0  ;;  %s3804_s24 = smov (!%p26_p0, %s28_s24), %s3187_s21 }
   0x7   : > { %p280_p3 = pnand %p2412_p1, %p279_p2  ;;  %p30_p4 = scmp.ge.s32.totalorder %s3804_s24, 2 }
   0x9   : > { %s3806_s24 = smov (%p30_p4, %s3804_s24), 0  ;;  %283 = sbr.rel (%p280_p3) target bundleno = 406 (0x196), region = 36 }
   0xe   : > { %v3077_v0 = vld [vmem:[%s3776_s3 + $0x78] sm:$0xff]   ;;  %s2413_s27 = sshll.u32 %s3175_s18, 2  ;;  %v3079_v2 = vld [vmem:[%s3776_s3 + $0x70] sm:$0xff]   ;;  %p354_p6 = scmp.lt.s32.totalorder %s3179_s19, 1  ;;  %v3081_v4 = vld [vmem:[%s3776_s3 + $0x68] sm:$0xff]   ;;  %v476_v9 = vlaneseq  ;;  %vm3193_vm0 = vmmov 1  }
   0xf   : > { %v3078_v1 = vld [vmem:[%s3776_s3 + $0x38] sm:$0xff]   ;;  %s2414_s30 = sadd.s32 4294967295, %s2413_s27  ;;  %2803 = vmatprep.subr.bf16.mxu0 %v3077_v0  ;;  %v3080_v3 = vld [vmem:[%s3776_s3 + $0x30] sm:$0xff]   ;;  %v3082_v5 = vld [vmem:[%s3776_s3 + $0x28] sm:$0xff]   ;;  %s2418_s28 = sshll.u32 %s3175_s18, 3  ;;  %v3194_v26 = vmov 0  }
  0x10   : > { %p351_p5 = scmp.gt.s32.totalorder %s2414_s30, 0  ;;  %2827 = vmatprep.subr.bf16.mxu1 %v3078_v1  ;;  %2804 = vmatpush3.bf16.msra.mxu0 %v3077_v0  ;;  %s3810_s19 = smov (!%p354_p6, %s3179_s19), 1  ;;  %v3083_v6 = vld [vmem:[%s3776_s3 + $0x60] sm:$0xff]   ;;  %v3085_v8 = vld [vmem:[%s3776_s3 + $0x58] sm:$0xff]   ;;  %v3087_v11 = vld [vmem:[%s3776_s3 + $0x50] sm:$0xff]   ;;  %v3310_v12 = vshrl.u32 %v476_v9, 7 }
  0x11   : > { %2828 = vmatpush3.bf16.msra.mxu1 %v3078_v1  ;;  %2805 = vmatprep.subr.bf16.mxu0 %v3079_v2  ;;  %s3288_s17 = sshll.u32 %s3810_s19, 5  ;;  %v3084_v7 = vld [vmem:[%s3776_s3 + $0x20] sm:$0xff]   ;;  %p370_p8 = scmp.lt.s32.totalorder %s2418_s28, 31  ;;  %v3086_v10 = vld [vmem:[%s3776_s3 + $0x18] sm:$0xff]   ;;  %v3088_v13 = vld [vmem:[%s3776_s3 + $0x10] sm:$0xff]   ;;  %vm867_vm11 = vcmask 1040384  }
  0x12   : > { %s3808_s30 = smov (!%p351_p5, %s2414_s30), 0  ;;  %2829 = vmatprep.subr.bf16.mxu1 %v3080_v3  ;;  %s2663_s9 = sadd.s32 4, %s2413_s27  ;;  %v478_v14 = vadd.s32 8, %v3310_v12  ;;  %v480_v15 = vadd.s32 24, %v3310_v12  ;;  %v493_v16 = vand.u32 15, %v3310_v12  ;;  %v3089_v17 = vld [vmem:[%s3776_s3 + $0x48] sm:$0xff]   ;;  %vm669_vm1 = vmpackc.low %vm3193_vm0, %vm3193_vm0 }
  0x13   : > { %s2415_s14 = sshll.u32 %s3808_s30, 1  ;;  %s3814_s28 = smov (!%p370_p8, %s2418_s28), 31  ;;  %v3090_v18 = vld [vmem:[%s3776_s3 + $0x8] sm:$0xff]   ;;  %v482_v21 = vadd.s32 40, %v3310_v12  ;;  %v3091_v22 = vld [vmem:[%s3776_s3 + $0x40] sm:$0xff]   ;;  %v3356_v27 = vsel %vm669_vm1, 65537, %v3194_v26 }
  0x14   : > { %2806 = vmatpush3.bf16.msra.mxu0 %v3079_v2  ;;  %p356_p7 = scmp.lt.s32.totalorder %s2415_s14, 31  ;;  %p379_p9 = scmp.lt.s32.totalorder %s2663_s9, 15  ;;  %v500_v19 = vand.u32 15, %v478_v14  ;;  %v514_v20 = vand.u32 15, %v480_v15  ;;  %v3092_v25 = vld [vmem:[%s3776_s3] sm:$0xff]   ;;  %vm3358_vm4 = vcmp.ne.s32.totalorder %v493_v16, 0 }
  0x15   : > { %2830 = vmatpush3.bf16.msra.mxu1 %v3080_v3  ;;  %2807 = vmatprep.subr.bf16.mxu0 %v3081_v4  ;;  %s373_s13 = sadd.s32 %s3288_s17, %s3814_s28  ;;  %p407_p10 = scmp.lt.s32.totalorder %s3175_s18, 3  ;;  %v528_v30 = vand.u32 15, %v482_v21  ;;  %vm759_vm7 = vmpackc.low %vm3358_vm4, %vm3358_vm4  ;;  %v3094_v34 = vld [vmem:[%s3776_s3 + $0xb8] sm:$0xff]   ;;  %vm813_vm10 = vsmask.f32 256  ;;  %v484_v44 = vadd.s32 56, %v3310_v12 }
  0x16   : > { %2831 = vmatprep.subr.bf16.mxu1 %v3082_v5  ;;  %s3812_s14 = smov (!%p356_p7, %s2415_s14), 31  ;;  %s3315_s15 = sshll.u32 %s373_s13, 2  ;;  %vm3344_vm2 = vcmp.ne.s32.totalorder %v500_v19, 15  ;;  %vm3348_vm3 = vcmp.ne.s32.totalorder %v514_v20, 15  ;;  %v771_v39 = vsel %vm759_vm7, 65537, %v3194_v26  ;;  %v3399_v40 = vld [vmem:[%s3776_s3 + $0xf8] sm:$0xff]  }
  0x17   : > { %s359_s6 = sadd.s32 %s3288_s17, %s3812_s14  ;;  %s2428_s16 = sshll.u32 %s3810_s19, 2  ;;  %vm670_vm5 = vmpackc.low %vm3344_vm2, %vm3344_vm2  ;;  %vm3389_vm9 = vcmp.ne.s32.totalorder %v528_v30, 15  ;;  %v2442_v45 = vcombine.low %v771_v39, %v3356_v27  ;;  %v3096_v53 = vld [vmem:[%s3776_s3 + $0xb0] sm:$0xff]   ;;  %v542_v55 = vand.u32 15, %v484_v44  ;;  %v3098_v60 = vld [vmem:[%s3776_s3 + $0xa8] sm:$0xff]   ;;  %v479_v0 = vadd.s32 16, %v3310_v12 }
  0x18   : > { %2808 = vmatpush3.bf16.msra.mxu0 %v3081_v4  ;;  %s3303_s10 = sshll.u32 %s359_s6, 2  ;;  %s3322_s29 = scalar_lea.vmem %s3774_s1, %s3315_s15  ;;  %vm672_vm6 = vmpackc.low %vm3348_vm3, %vm3348_vm3  ;;  %v682_v31 = vsel %vm670_vm5, 65537, %v3194_v26  ;;  %v3097_v9 = vld [vmem:[%s3776_s3 + $0xf0] sm:$0xff]   ;;  %v3100_v15 = vld [vmem:[%s3776_s3 + $0xa0] sm:$0xff]   ;;  %vm870_vm7 = vsmask.f32 7424 }
  0x19   : > { %2832 = vmatpush3.bf16.msra.mxu1 %v3082_v5  ;;  %2809 = vmatprep.subr.bf16.mxu0 %v3083_v6  ;;  %p420_p11 = scmp.gt.s32.totalorder %s3175_s18, 0  ;;  %s3816_s9 = smov (!%p379_p9, %s2663_s9), 15  ;;  %v3368_v29 = vld [vmem:[%s3322_s29] sm:$0xff]   ;;  %v684_v32 = vsel %vm672_vm6, 65537, %v3194_v26  ;;  %v2436_v37 = vcombine.low %v3356_v27, %v682_v31  ;;  %vm674_vm12 = vmpackc.low %vm3389_vm9, %vm3389_vm9  ;;  %v3409_v51 = vld [vmem:[%s3322_s29 + $0x8] sm:$0xff]   ;;  %vm3416_vm15 = vcmp.ne.s16.totalorder %v2442_v45, 0 }
  0x1a   : > { %2833 = vmatprep.subr.bf16.mxu1 %v3084_v7  ;;  %s408_s7 = scalar_select %p407_p10, %s3175_s18, 3  ;;  %v2437_v33 = vcombine.low %v3356_v27, %v684_v32  ;;  %v686_v52 = vsel %vm674_vm12, 65537, %v3194_v26  ;;  %v3425_v61 = vld [vmem:[%s3322_s29 + $0x10] sm:$0xff]   ;;  %vm640_vm1 = vcmp.ne.s32.totalorder %v542_v55, 15  ;;  %vm3433_vm3 = vmand %vm867_vm11, %vm813_vm10  ;;  %v3099_v20 = vld [vmem:[%s3776_s3 + $0xe8] sm:$0xff]   ;;  %v485_v44 = vadd.s32 64, %v3310_v12 }
  0x1b   : > { %s2422_s8 = sshll.u32 %s3816_s9, 1  ;;  %s361_s25 = scalar_lea.vmem %s3773_s0, %s3303_s10  ;;  %vm711_vm14 = vcmp.ne.s16.totalorder %v2436_v37, 0  ;;  %v2438_v54 = vcombine.low %v3356_v27, %v686_v52  ;;  %vm676_vm2 = vmpackc.low %vm640_vm1, %vm640_vm1  ;;  %v3102_v21 = vld [vmem:[%s3776_s3 + $0x98] sm:$0xff]   ;;  %v483_v37 = vadd.s32 48, %v3310_v12 }
  0x1c   : > { %2810 = vmatpush3.bf16.msra.mxu0 %v3083_v6  ;;  %p384_p12 = scmp.lt.s32.totalorder %s2422_s8, 31  ;;  %s3342_s13 = sadd.s32 %s2428_s16, %s408_s7  ;;  %v416_v35 = vld [vmem:[%s361_s25] sm:$0xf]  ;;  %v417_v36 = vld [vmem:[%s361_s25 + $0x4] sm:$0xf]  ;;  %vm712_vm8 = vcmp.ne.s16.totalorder %v2437_v33, 0 }
  0x1d   : > { %2834 = vmatpush3.bf16.msra.mxu1 %v3084_v7  ;;  %2811 = vmatprep.subr.bf16.mxu0 %v3085_v8  ;;  %s421_s10 = scalar_select %p420_p11, 1, 0  ;;  %v718_v41 = vsel %vm712_vm8, %v3368_v29, 0  ;;  %vm713_vm0 = vcmp.ne.s16.totalorder %v2438_v54, 0  ;;  %v688_v4 = vsel %vm676_vm2, 65537, %v3194_v26  ;;  %v507_v7 = vand.u32 15, %v479_v0 }
  0x1e   : > { %2835 = vmatprep.subr.bf16.mxu1 %v3086_v10  ;;  %s3818_s8 = smov (!%p384_p12, %s2422_s8), 31  ;;  %v822_v43 = vshrl.u32 %v718_v41, 16  ;;  %v825_v49 = vshll.u32 %v718_v41, 16  ;;  %v719_v63 = vsel %vm713_vm0, %v3409_v51, 0  ;;  %v2439_v6 = vcombine.low %v3356_v27, %v688_v4  ;;  %v3106_v41 = vld [vmem:[%s3776_s3 + $0x90] sm:$0xff]   ;;  %s3747_s18 = scalar_lea.vmem %s3777_s4, %s3315_s15 }
  0x1f   : > { %s387_s26 = sadd.s32 %s3288_s17, %s3818_s8  ;;  %v422_v42 = vstv %s421_s10  ;;  %v830_v2 = vshrl.u32 %v719_v63, 16  ;;  %v833_v3 = vshll.u32 %v719_v63, 16  ;;  %vm725_vm5 = vcmp.ne.s32.totalorder %v507_v7, 0  ;;  %s2429_s15 = sshll.u32 %s3342_s13, 1 }
  0x20   : > { %2812 = vmatpush3.bf16.msra.mxu0 %v3085_v8  ;;  %vm423_vm13 = vcmp.eq.s32.totalorder %v422_v42, 1  ;;  %v824_v48 = vrot.slane %v822_v43, 7  ;;  %vm714_vm4 = vcmp.ne.s16.totalorder %v2439_v6, 0  ;;  %vm761_vm6 = vmpackc.low %vm725_vm5, %vm725_vm5  ;;  %v535_v43 = vand.u32 15, %v483_v37  ;;  %s2424_s11 = sshll.u32 %s387_s26, 2  ;;  %v3117_v37 = vld [vmem:[%s3776_s3 + $0x128] sm:$0xff]  }
  0x21   : > { %2836 = vmatpush3.bf16.msra.mxu1 %v3086_v10  ;;  %2813 = vmatprep.subr.bf16.mxu0 %v3087_v11  ;;  %v424_v46 = vsel %vm423_vm13, %v416_v35, 0  ;;  %v425_v47 = vsel %vm423_vm13, %v417_v36, 0  ;;  %v832_v10 = vrot.slane %v830_v2, 7  ;;  %v773_v23 = vsel %vm761_vm6, 65537, %v3194_v26  ;;  %v3101_v35 = vld [vmem:[%s3776_s3 + $0xe0] sm:$0xff]   ;;  %s389_s14 = scalar_lea.vmem %s3775_s2, %s2424_s11  ;;  %s412_s11 = scalar_lea.vmem %s3778_s5, %s2429_s15 }
  0x22   : > { %2837 = vmatprep.subr.bf16.mxu1 %v3088_v13  ;;  %v2430_v50 = vcombine.low %v424_v46, %v425_v47  ;;  %v827_v62 = vor.u32 %v825_v49, %v824_v48  ;;  %v2443_v30 = vcombine.low %v773_v23, %v3356_v27  ;;  %v3103_v47 = vld [vmem:[%s3776_s3 + $0xd8] sm:$0xff]   ;;  %vm729_vm13 = vcmp.ne.s32.totalorder %v535_v43, 0  ;;  %v3110_v2 = vld [vmem:[%s3776_s3 + $0x80] sm:$0xff]   ;;  %s427_s10 = scalar_select %p407_p10, 1, 0 }
  0x23   : > { %v835_v16 = vor.u32 %v833_v3, %v832_v10  ;;  %v549_v49 = vand.u32 15, %v485_v44 }
  0x24   : > { %2814 = vmatpush3.bf16.msra.mxu0 %v3087_v11  ;;  %2819 = vmatprep.mubr.bf16.mxu0 %v2430_v50  ;;  %v717_v57 = vsel %vm711_vm14, %v2430_v50, 0  ;;  %v807_v11 = vsel %vm3416_vm15, %v2430_v50, 0  ;;  %vm802_vm8 = vcmp.ne.s16.totalorder %v2443_v30, 0  ;;  %v486_v50 = vadd.s32 72, %v3310_v12  ;;  %vm765_vm15 = vmpackc.low %vm729_vm13, %vm729_vm13 }
  0x25   : > { %2838 = vmatpush3.bf16.msra.mxu1 %v3088_v13  ;;  %2815 = vmatprep.subr.bf16.mxu0 %v3089_v17  ;;  %v815_v58 = vshrl.u32 %v717_v57, 16  ;;  %v818_v59 = vshll.u32 %v717_v57, 16  ;;  %v874_v24 = vshll.u32 %v807_v11, 16  ;;  %v872_v31 = vshrl.u32 %v807_v11, 16 }
  0x26   : > { %2839 = vmatprep.subr.bf16.mxu1 %v3090_v18  ;;  %v3475_v36 = vsel %vm802_vm8, %v3368_v29, 0  ;;  %v777_v55 = vsel %vm765_vm15, 65537, %v3194_v26  ;;  %vm731_vm0 = vcmp.ne.s32.totalorder %v549_v49, 0  ;;  %v556_v56 = vand.u32 15, %v486_v50  ;;  %v3118_v50 = vld [vmem:[%s3776_s3 + $0x168] sm:$0xff]  }
  0x27   : > { %v817_v1 = vrot.slane %v815_v58, 7  ;;  %v876_v32 = vrot.slane %v874_v24, 1  ;;  %v883_v57 = vshrl.u32 %v3475_v36, 16  ;;  %v2445_v58 = vcombine.low %v777_v55, %v3356_v27  ;;  %vm767_vm1 = vmpackc.low %vm731_vm0, %vm731_vm0 }
  0x28   : > { %2816 = vmatpush3.bf16.msra.mxu0 %v3089_v17  ;;  %v720_v17 = vsel %vm714_vm4, %v3425_v61, 0  ;;  %vm642_vm2 = vcmp.ne.s32.totalorder %v556_v56, 15  ;;  %v428_v44 = vstv %s427_s10  ;;  %v3120_v56 = vld [vmem:[%s3776_s3 + $0x160] sm:$0xff]   ;;  %vm924_vm0 = vcmask 1047552  }
  0x29   : > { %2840 = vmatpush3.bf16.msra.mxu1 %v3090_v18  ;;  %2817 = vmatprep.subr.bf16.mxu0 %v3091_v22  ;;  %v820_v8 = vor.u32 %v818_v59, %v817_v1  ;;  %v3444_v13 = vsel %vm813_vm10, %v817_v1, %v827_v62  ;;  %v838_v18 = vshrl.u32 %v720_v17, 16  ;;  %v841_v19 = vshll.u32 %v720_v17, 16  ;;  %v3505_v62 = vld [vmem:[%s3322_s29 + $0x18] sm:$0xff]   ;;  %vm678_vm4 = vmpackc.low %vm642_vm2, %vm642_vm2  ;;  %v3107_v1 = vld [vmem:[%s3776_s3 + $0xd0] sm:$0xff]  }
  0x2a   : > { %2841 = vmatprep.subr.bf16.mxu1 %v3092_v25  ;;  %v877_v39 = vor.u32 %v876_v32, %v872_v31  ;;  %v779_v59 = vsel %vm767_vm1, 65537, %v3194_v26  ;;  %v690_v4 = vsel %vm678_vm4, 65537, %v3194_v26  ;;  %vm3620_vm2 = vmand %vm924_vm0, %vm870_vm7 }
  0x2b   : > { %v869_v14 = vsel %vm3433_vm3, 0, %v820_v8  ;;  %v3466_v28 = vrot.slane %v838_v18, 7  ;;  %vm804_vm3 = vcmp.ne.s16.totalorder %v2445_v58, 0  ;;  %v2446_v63 = vcombine.low %v779_v59, %v3356_v27  ;;  %v3109_v8 = vld [vmem:[%s3776_s3 + $0xc8] sm:$0xff]   ;;  %v3123_v58 = vld [vmem:[%s3776_s3 + $0x110] sm:$0xff]  }
  0x2c   : > { %2818 = vmatpush3.bf16.msra.mxu0 %v3091_v22  ;;  %2843 = vmatprep.mubr.bf16.mxu1 %v869_v14  ;;  %v3460_v22 = vsel %vm813_vm10, %v824_v48, %v835_v16  ;;  %v3108_v48 = vld [vmem:[%s3776_s3 + $0x88] sm:$0xff]   ;;  %v810_v3 = vsel %vm804_vm3, %v3425_v61, 0  ;;  %v2440_v7 = vcombine.low %v3356_v27, %v690_v4  ;;  %v3112_v14 = vld [vmem:[%s3776_s3 + $0x138] sm:$0xff]  }
  0x2d   : > { %2842 = vmatpush3.bf16.msra.mxu1 %v3092_v25  ;;  %2851 = vmatprep.subr.bf16.mxu0 %v3094_v34  ;;  %v481_v25 = vadd.s32 32, %v3310_v12  ;;  %vm805_vm5 = vcmp.ne.s16.totalorder %v2446_v63, 0  ;;  %v895_v6 = vshll.u32 %v810_v3, 16  ;;  %v899_v18 = vshrl.u32 %v810_v3, 16  ;;  %v3127_v3 = vld [vmem:[%s3776_s3 + $0x100] sm:$0xff]   ;;  %v3126_v4 = vld [vmem:[%s3776_s3 + $0x148] sm:$0xff]  }
  0x2e   : > { %2875 = vmatprep.subr.bf16.mxu1 %v3399_v40  ;;  %v3521_v11 = vsel %vm805_vm5, %v3505_v62, 0  ;;  %vm715_vm8 = vcmp.ne.s16.totalorder %v2440_v7, 0  ;;  %v3131_v7 = vld [vmem:[%s3776_s3 + $0x1b0] sm:$0xff]  }
  0x2f   : > { %2820 = vmatmul.mubr.bf16.vlgmr.msra.gmra.mxu0 %v3368_v29  ;;  %v521_v33 = vand.u32 15, %v481_v25  ;;  %v897_v17 = vrot.slane %v895_v6, 1  ;;  %v721_v23 = vsel %vm715_vm8, %v3505_v62, 0  ;;  %v3113_v25 = vld [vmem:[%s3776_s3 + $0x178] sm:$0xff]   ;;  %v3128_v6 = vld [vmem:[%s3776_s3 + $0x140] sm:$0xff]  }
  0x30   : > { %2852 = vmatpush3.bf16.msra.mxu0 %v3094_v34  ;;  %2823 = vmatprep.mubr.bf16.mxu0 %v3409_v51  ;;  %v843_v34 = vor.u32 %v841_v19, %v3466_v28  ;;  %v903_v19 = vshll.u32 %v3521_v11, 16  ;;  %v849_v43 = vshll.u32 %v721_v23, 16 }
  0x31   : > { %2853 = vmatprep.subr.bf16.mxu0 %v3096_v53  ;;  %2844 = vmatmul.mubr.bf16.vlgmr.msra.gmra.mxu1 %v3444_v13  ;;  %vm727_vm9 = vcmp.ne.s32.totalorder %v521_v33, 0  ;;  %v901_v32 = vor.u32 %v899_v18, %v897_v17  ;;  %v3136_v18 = vld [vmem:[%s3776_s3 + $0x1e0] sm:$0xff]  }
  0x32   : > { %2876 = vmatpush3.bf16.msra.mxu1 %v3399_v40  ;;  %2847 = vmatprep.mubr.bf16.mxu1 %v3460_v22  ;;  %v3479_v38 = vsel %vm813_vm10, %v832_v10, %v843_v34  ;;  %v879_v40 = vshll.u32 %v3475_v36, 16  ;;  %vm763_vm12 = vmpackc.low %vm727_vm9, %vm727_vm9  ;;  %v3559_v33 = vrot.slane %v903_v19, 1  ;;  %v846_v34 = vshrl.u32 %v721_v23, 16  ;;  %v419_v36 = vld [vmem:[%s389_s14 + $0x4] sm:$0xf]  ;;  %v3138_v19 = vld [vmem:[%s3776_s3 + $0x1d8] sm:$0xff]  }
  0x33   : > { %2877 = vmatprep.subr.bf16.mxu1 %v3097_v9  ;;  %v775_v42 = vsel %vm763_vm12, 65537, %v3194_v26  ;;  %vm429_vm12 = vcmp.eq.s32.totalorder %v428_v44, 1  ;;  %v3142_v23 = vld [vmem:[%s3776_s3 + $0x1c8] sm:$0xff]  }
  0x34   : > { %2854 = vmatpush3.bf16.msra.mxu0 %v3096_v53  ;;  %v881_v45 = vrot.slane %v879_v40, 1  ;;  %v2444_v46 = vcombine.low %v775_v42, %v3356_v27  ;;  %v487_v53 = vadd.s32 80, %v3310_v12  ;;  %v3115_v40 = vld [vmem:[%s3776_s3 + $0x170] sm:$0xff]   ;;  %v3575_v42 = vrot.slane %v846_v34, 7 }
  0x35   : > { %2855 = vmatprep.subr.bf16.mxu0 %v3098_v60  ;;  %v3146_v34 = vld [vmem:[%s3776_s3 + $0x230] sm:$0xff]  }
  0x36   : > { %2878 = vmatpush3.bf16.msra.mxu1 %v3097_v9  ;;  %v882_v52 = vsel %vm870_vm7, %v877_v39, %v881_v45  ;;  %vm803_vm14 = vcmp.ne.s16.totalorder %v2444_v46, 0  ;;  %v563_v0 = vand.u32 15, %v487_v53  ;;  %v885_v9 = vor.u32 %v883_v57, %v881_v45  ;;  %v3121_v53 = vld [vmem:[%s3776_s3 + $0x118] sm:$0xff]  }
  0x37   : > { %2824 = vmatmul.mubr.bf16.gmra.mxu0 %v3425_v61  ;;  %2879 = vmatprep.subr.bf16.mxu1 %v3099_v20  ;;  %v809_v54 = vsel %vm803_vm14, %v3409_v51, 0  ;;  %v488_v39 = vadd.s32 88, %v3310_v12  ;;  %v3119_v12 = vld [vmem:[%s3776_s3 + $0x120] sm:$0xff]   ;;  %v431_v46 = vsel %vm429_vm12, %v419_v36, 0  ;;  %v851_v49 = vor.u32 %v849_v43, %v3575_v42  ;;  %v3147_v36 = vld [vmem:[%s3776_s3 + $0x228] sm:$0xff]  }
  0x38   : > { %2856 = vmatpush3.bf16.msra.mxu0 %v3098_v60  ;;  %2867 = vmatprep.mubr.bf16.mxu0 %v882_v52  ;;  %v887_v60 = vshll.u32 %v809_v54, 16  ;;  %v891_v5 = vshrl.u32 %v809_v54, 16  ;;  %vm3523_vm6 = vcmp.ne.s32.totalorder %v563_v0, 0  ;;  %v3125_v0 = vld [vmem:[%s3776_s3 + $0x108] sm:$0xff]  }
  0x39   : > { %2857 = vmatprep.subr.bf16.mxu0 %v3100_v15  ;;  %2848 = vmatmul.mubr.bf16.gmra.mxu1 %v3479_v38  ;;  %vm769_vm9 = vmpackc.low %vm3523_vm6, %vm3523_vm6  ;;  %v3596_v55 = vsel %vm813_vm10, %v3466_v28, %v851_v49 }
  0x3a   : > { %2880 = vmatpush3.bf16.msra.mxu1 %v3099_v20  ;;  %2891 = vmatprep.mubr.bf16.mxu1 %v3444_v13  ;;  %v889_v10 = vrot.slane %v887_v60, 1  ;;  %v781_v24 = vsel %vm769_vm9, 65537, %v3194_v26  ;;  %v3122_v60 = vld [vmem:[%s3776_s3 + $0x158] sm:$0xff]   ;;  %v3132_v13 = vld [vmem:[%s3776_s3 + $0x1f0] sm:$0xff]  }
  0x3b   : > { %2881 = vmatprep.subr.bf16.mxu1 %v3101_v35  ;;  %v2447_v31 = vcombine.low %v781_v24, %v3356_v27 }
  0x3c   : > { %2858 = vmatpush3.bf16.msra.mxu0 %v3100_v15  ;;  %v3111_v15 = vld [vmem:[%s3776_s3 + $0xc0] sm:$0xff]   ;;  %v893_v16 = vor.u32 %v891_v5, %v889_v10  ;;  %v3541_v20 = vsel %vm870_vm7, %v885_v9, %v889_v10  ;;  %v3129_v5 = vld [vmem:[%s3776_s3 + $0x1b8] sm:$0xff]   ;;  %v3133_v9 = vld [vmem:[%s3776_s3 + $0x1a8] sm:$0xff]   ;;  %v907_v10 = vshrl.u32 %v3521_v11, 16 }
  0x3d   : > { %2859 = vmatprep.subr.bf16.mxu0 %v3102_v21  ;;  %vm806_vm13 = vcmp.ne.s16.totalorder %v2447_v31, 0  ;;  %v3134_v11 = vld [vmem:[%s3776_s3 + $0x1e8] sm:$0xff]   ;;  %v3144_v31 = vld [vmem:[%s3776_s3 + $0x1c0] sm:$0xff]  }
  0x3e   : > { %2882 = vmatpush3.bf16.msra.mxu1 %v3101_v35  ;;  %v3556_v30 = vsel %vm870_vm7, %v893_v16, %v897_v17  ;;  %v418_v35 = vld [vmem:[%s389_s14] sm:$0xf]  ;;  %v3137_v16 = vld [vmem:[%s3776_s3 + $0x198] sm:$0xff]  }
  0x3f   : > { %2883 = vmatprep.subr.bf16.mxu1 %v3103_v47  ;;  %v430_v45 = vsel %vm429_vm12, %v418_v35, 0 }
  0x40   : > { %2860 = vmatpush3.bf16.msra.mxu0 %v3102_v21  ;;  %v3114_v21 = vld [vmem:[%s3776_s3 + $0x130] sm:$0xff]  }
  0x41   : > { %2861 = vmatprep.subr.bf16.mxu0 %v3106_v41 }
  0x42   : > { %2884 = vmatpush3.bf16.msra.mxu1 %v3103_v47  ;;  %v570_v47 = vand.u32 15, %v488_v39  ;;  %v3149_v39 = vld [vmem:[%s3776_s3 + $0x218] sm:$0xff]  }
  0x43   : > { %2885 = vmatprep.subr.bf16.mxu1 %v3107_v1 }
  0x44   : > { %2862 = vmatpush3.bf16.msra.mxu0 %v3106_v41  ;;  %v3573_v41 = vsel %vm870_vm7, %v901_v32, %v3559_v33  ;;  %vm644_vm14 = vcmp.ne.s32.totalorder %v570_v47, 15 }
  0x45   : > { %2863 = vmatprep.subr.bf16.mxu0 %v3108_v48  ;;  %vm680_vm15 = vmpackc.low %vm644_vm14, %vm644_vm14 }
  0x46   : > { %2886 = vmatpush3.bf16.msra.mxu1 %v3107_v1  ;;  %v692_v59 = vsel %vm680_vm15, 65537, %v3194_v26  ;;  %v3124_v1 = vld [vmem:[%s3776_s3 + $0x150] sm:$0xff]  }
  0x47   : > { %2887 = vmatprep.subr.bf16.mxu1 %v3109_v8  ;;  %v2441_v28 = vcombine.low %v3356_v27, %v692_v59 }
  0x48   : > { %2864 = vmatpush3.bf16.msra.mxu0 %v3108_v48  ;;  %v3582_v48 = vcombine.low %v430_v45, %v431_v46 }
  0x49   : > { %2865 = vmatprep.subr.bf16.mxu0 %v3110_v2  ;;  %vm716_vm1 = vcmp.ne.s16.totalorder %v2441_v28, 0 }
  0x4a   : > { %2888 = vmatpush3.bf16.msra.mxu1 %v3109_v8  ;;  %v812_v52 = vsel %vm806_vm13, %v3582_v48, 0  ;;  %v3617_v26 = vsel %vm716_vm1, %v3582_v48, 0  ;;  %v3130_v8 = vld [vmem:[%s3776_s3 + $0x1f8] sm:$0xff]  }
  0x4b   : > { %2889 = vmatprep.subr.bf16.mxu1 %v3111_v15  ;;  %v911_v54 = vshll.u32 %v812_v52, 16  ;;  %v915_v57 = vshrl.u32 %v812_v52, 16  ;;  %v854_v24 = vshrl.u32 %v3617_v26, 16 }
  0x4c   : > { %2866 = vmatpush3.bf16.msra.mxu0 %v3110_v2 }
  0x4d   : > { %2899 = vmatprep.subr.bf16.mxu0 %v3112_v14  ;;  %v856_v32 = vrot.slane %v854_v24, 7 }
  0x4e   : > { %2890 = vmatpush3.bf16.msra.mxu1 %v3111_v15  ;;  %v909_v15 = vor.u32 %v907_v10, %v3559_v33  ;;  %v857_v33 = vshll.u32 %v3617_v26, 16 }
  0x4f   : > { %2868 = vmatmul.mubr.bf16.vlgmr.msra.gmra.mxu0 %v3541_v20  ;;  %2923 = vmatprep.subr.bf16.mxu1 %v3113_v25 }
  0x50   : > { %2900 = vmatpush3.bf16.msra.mxu0 %v3112_v14  ;;  %2871 = vmatprep.mubr.bf16.mxu0 %v3556_v30  ;;  %v3135_v14 = vld [vmem:[%s3776_s3 + $0x1a0] sm:$0xff]   ;;  %v859_v35 = vor.u32 %v857_v33, %v856_v32 }
  0x51   : > { %2901 = vmatprep.subr.bf16.mxu0 %v3114_v21  ;;  %2892 = vmatmul.mubr.bf16.vlgmr.msra.gmra.mxu1 %v3460_v22 }
  0x52   : > { %2924 = vmatpush3.bf16.msra.mxu1 %v3113_v25  ;;  %2895 = vmatprep.mubr.bf16.mxu1 %v3479_v38  ;;  %v3145_v25 = vld [vmem:[%s3776_s3 + $0x238] sm:$0xff]  }
  0x53   : > { %2925 = vmatprep.subr.bf16.mxu1 %v3115_v40 }
  0x54   : > { %2902 = vmatpush3.bf16.msra.mxu0 %v3114_v21  ;;  %v3140_v21 = vld [vmem:[%s3776_s3 + $0x1d0] sm:$0xff]  }
  0x55   : > { %2903 = vmatprep.subr.bf16.mxu0 %v3117_v37 }
  0x56   : > { %2926 = vmatpush3.bf16.msra.mxu1 %v3115_v40 }
  0x57   : > { %2872 = vmatmul.mubr.bf16.gmra.mxu0 %v3573_v41  ;;  %2927 = vmatprep.subr.bf16.mxu1 %v3118_v50 }
  0x58   : > { %2904 = vmatpush3.bf16.msra.mxu0 %v3117_v37  ;;  %2915 = vmatprep.mubr.bf16.mxu0 %v3368_v29  ;;  %v913_v29 = vrot.slane %v911_v54, 1  ;;  %v860_v37 = vsel %vm813_vm10, %v3575_v42, %v859_v35 }
  0x59   : > { %2905 = vmatprep.subr.bf16.mxu0 %v3119_v12  ;;  %2896 = vmatmul.mubr.bf16.gmra.mxu1 %v3596_v55 }
  0x5a   : > { %2928 = vmatpush3.bf16.msra.mxu1 %v3118_v50  ;;  %2939 = vmatprep.mubr.bf16.mxu1 %v3541_v20  ;;  %v3611_v63 = vor.u32 %v915_v57, %v913_v29  ;;  %v3672_v17 = vsel %vm870_vm7, %v909_v15, %v913_v29  ;;  %v3141_v20 = vld [vmem:[%s3776_s3 + $0x188] sm:$0xff]  }
  0x5b   : > { %2929 = vmatprep.subr.bf16.mxu1 %v3120_v56 }
  0x5c   : > { %2906 = vmatpush3.bf16.msra.mxu0 %v3119_v12  ;;  %v926_v2 = vsel %vm3620_vm2, %v3611_v63, 0 }
  0x5d   : > { %2907 = vmatprep.subr.bf16.mxu0 %v3121_v53 }
  0x5e   : > { %2930 = vmatpush3.bf16.msra.mxu1 %v3120_v56 }
  0x5f   : > { %2931 = vmatprep.subr.bf16.mxu1 %v3122_v60 }
  0x60   : > { %2908 = vmatpush3.bf16.msra.mxu0 %v3121_v53 }
  0x61   : > { %2909 = vmatprep.subr.bf16.mxu0 %v3123_v58 }
  0x62   : > { %2932 = vmatpush3.bf16.msra.mxu1 %v3122_v60 }
  0x63   : > { %2933 = vmatprep.subr.bf16.mxu1 %v3124_v1 }
  0x64   : > { %2910 = vmatpush3.bf16.msra.mxu0 %v3123_v58 }
  0x65   : > { %2911 = vmatprep.subr.bf16.mxu0 %v3125_v0 }
  0x66   : > { %2934 = vmatpush3.bf16.msra.mxu1 %v3124_v1 }
  0x67   : > { %2935 = vmatprep.subr.bf16.mxu1 %v3126_v4 }
  0x68   : > { %2912 = vmatpush3.bf16.msra.mxu0 %v3125_v0 }
  0x69   : > { %2913 = vmatprep.subr.bf16.mxu0 %v3127_v3 }
  0x6a   : > { %2936 = vmatpush3.bf16.msra.mxu1 %v3126_v4 }
  0x6b   : > { %2937 = vmatprep.subr.bf16.mxu1 %v3128_v6 }
  0x6c   : > { %2914 = vmatpush3.bf16.msra.mxu0 %v3127_v3 }
  0x6d   : > { %2947 = vmatprep.subr.bf16.mxu0 %v3129_v5 }
  0x6e   : > { %2938 = vmatpush3.bf16.msra.mxu1 %v3128_v6 }
  0x6f   : > { %2916 = vmatmul.mubr.bf16.vlgmr.msra.gmra.mxu0 %v3409_v51  ;;  %2971 = vmatprep.subr.bf16.mxu1 %v3130_v8 }
  0x70   : > { %2948 = vmatpush3.bf16.msra.mxu0 %v3129_v5  ;;  %2919 = vmatprep.mubr.bf16.mxu0 %v3425_v61 }
  0x71   : > { %2949 = vmatprep.subr.bf16.mxu0 %v3131_v7  ;;  %2940 = vmatmul.mubr.bf16.vlgmr.msra.gmra.mxu1 %v3556_v30 }
  0x72   : > { %2972 = vmatpush3.bf16.msra.mxu1 %v3130_v8  ;;  %2943 = vmatprep.mubr.bf16.mxu1 %v3573_v41 }
  0x73   : > { %2973 = vmatprep.subr.bf16.mxu1 %v3132_v13 }
  0x74   : > { %2950 = vmatpush3.bf16.msra.mxu0 %v3131_v7 }
  0x75   : > { %2951 = vmatprep.subr.bf16.mxu0 %v3133_v9 }
  0x76   : > { %2974 = vmatpush3.bf16.msra.mxu1 %v3132_v13 }
  0x77   : > { %2920 = vmatmul.mubr.bf16.gmra.mxu0 %v3505_v62  ;;  %2975 = vmatprep.subr.bf16.mxu1 %v3134_v11 }
  0x78   : > { %2952 = vmatpush3.bf16.msra.mxu0 %v3133_v9  ;;  %2963 = vmatprep.mubr.bf16.mxu0 %v3460_v22  ;;  %v3139_v22 = vld [vmem:[%s3776_s3 + $0x190] sm:$0xff]  }
  0x79   : > { %2953 = vmatprep.subr.bf16.mxu0 %v3135_v14  ;;  %2944 = vmatmul.mubr.bf16.gmra.mxu1 %v3672_v17 }
  0x7a   : > { %2976 = vmatpush3.bf16.msra.mxu1 %v3134_v11  ;;  %2987 = vmatprep.mubr.bf16.mxu1 %v3409_v51  ;;  %v3143_v51 = vld [vmem:[%s3776_s3 + $0x180] sm:$0xff]  }
  0x7b   : > { %2977 = vmatprep.subr.bf16.mxu1 %v3136_v18 }
  0x7c   : > { %2954 = vmatpush3.bf16.msra.mxu0 %v3135_v14 }
  0x7d   : > { %2955 = vmatprep.subr.bf16.mxu0 %v3137_v16 }
  0x7e   : > { %2978 = vmatpush3.bf16.msra.mxu1 %v3136_v18 }
  0x7f   : > { %2979 = vmatprep.subr.bf16.mxu1 %v3138_v19 }
  0x80   : > { %2956 = vmatpush3.bf16.msra.mxu0 %v3137_v16 }
  0x81   : > { %2957 = vmatprep.subr.bf16.mxu0 %v3139_v22 }
  0x82   : > { %2980 = vmatpush3.bf16.msra.mxu1 %v3138_v19 }
  0x83   : > { %2981 = vmatprep.subr.bf16.mxu1 %v3140_v21 }
  0x84   : > { %2958 = vmatpush3.bf16.msra.mxu0 %v3139_v22 }
  0x85   : > { %2959 = vmatprep.subr.bf16.mxu0 %v3141_v20 }
  0x86   : > { %2982 = vmatpush3.bf16.msra.mxu1 %v3140_v21 }
  0x87   : > { %2983 = vmatprep.subr.bf16.mxu1 %v3142_v23 }
  0x88   : > { %2960 = vmatpush3.bf16.msra.mxu0 %v3141_v20 }
  0x89   : > { %2961 = vmatprep.subr.bf16.mxu0 %v3143_v51 }
  0x8a   : > { %2984 = vmatpush3.bf16.msra.mxu1 %v3142_v23 }
  0x8b   : > { %2985 = vmatprep.subr.bf16.mxu1 %v3144_v31 }
  0x8c   : > { %2962 = vmatpush3.bf16.msra.mxu0 %v3143_v51 }
  0x8d   : > { %2995 = vmatprep.subr.bf16.mxu0 %v3145_v25 }
  0x8e   : > { %2986 = vmatpush3.bf16.msra.mxu1 %v3144_v31 }
  0x8f   : > { %2964 = vmatmul.mubr.bf16.vlgmr.msra.gmra.mxu0 %v3479_v38  ;;  %3019 = vmatprep.subr.bf16.mxu1 %v3145_v25  ;;  %v3148_v38 = vld [vmem:[%s3776_s3 + $0x220] sm:$0xff]  }
  0x90   : > { %2996 = vmatpush3.bf16.msra.mxu0 %v3145_v25  ;;  %2967 = vmatprep.mubr.bf16.mxu0 %v3596_v55 }
  0x91   : > { %2997 = vmatprep.subr.bf16.mxu0 %v3146_v34  ;;  %2988 = vmatmul.mubr.bf16.vlgmr.msra.gmra.mxu1 %v3425_v61  ;;  %v3150_v61 = vld [vmem:[%s3776_s3 + $0x210] sm:$0xff]  }
  0x92   : > { %3027 = vmatpush3.bf16.msra.mxu1 %v3145_v25  ;;  %2991 = vmatprep.mubr.bf16.mxu1 %v3505_v62  ;;  %v3151_v62 = vld [vmem:[%s3776_s3 + $0x208] sm:$0xff]  }
  0x93   : > { %3020 = vmatprep.subr.bf16.mxu1 %v3146_v34 }
  0x94   : > { %2998 = vmatpush3.bf16.msra.mxu0 %v3146_v34 }
  0x95   : > { %2999 = vmatprep.subr.bf16.mxu0 %v3147_v36 }
  0x96   : > { %3028 = vmatpush3.bf16.msra.mxu1 %v3146_v34 }
  0x97   : > { %2968 = vmatmul.mubr.bf16.gmra.mxu0 %v860_v37  ;;  %3021 = vmatprep.subr.bf16.mxu1 %v3147_v36 }
  0x98   : > { %3000 = vmatpush3.bf16.msra.mxu0 %v3147_v36  ;;  %3011 = vmatprep.mubr.bf16.mxu0 %v3556_v30  ;;  %v3152_v30 = vld [vmem:[%s3776_s3 + $0x200] sm:$0xff]  }
  0x99   : > { %3001 = vmatprep.subr.bf16.mxu0 %v3148_v38  ;;  %2992 = vmatmul.mubr.bf16.gmra.mxu1 %v3582_v48 }
  0x9a   : > { %3029 = vmatpush3.bf16.msra.mxu1 %v3147_v36  ;;  %3015 = vmatprep.mubr.bf16.mxu1 %v3672_v17 }
  0x9b   : > { %3022 = vmatprep.subr.bf16.mxu1 %v3148_v38 }
  0x9c   : > { %3002 = vmatpush3.bf16.msra.mxu0 %v3148_v38 }
  0x9d   : > { %3003 = vmatprep.subr.bf16.mxu0 %v3149_v39 }
  0x9e   : > { %3030 = vmatpush3.bf16.msra.mxu1 %v3148_v38 }
  0x9f   : > { %3023 = vmatprep.subr.bf16.mxu1 %v3149_v39 }
  0xa0   : > { %3004 = vmatpush3.bf16.msra.mxu0 %v3149_v39 }
  0xa1   : > { %3005 = vmatprep.subr.bf16.mxu0 %v3150_v61 }
  0xa2   : > { %3031 = vmatpush3.bf16.msra.mxu1 %v3149_v39 }
  0xa3   : > { %3024 = vmatprep.subr.bf16.mxu1 %v3150_v61 }
  0xa4   : > { %3006 = vmatpush3.bf16.msra.mxu0 %v3150_v61 }
  0xa5   : > { %3007 = vmatprep.subr.bf16.mxu0 %v3151_v62 }
  0xa6   : > { %3032 = vmatpush3.bf16.msra.mxu1 %v3150_v61 }
  0xa7   : > { %3025 = vmatprep.subr.bf16.mxu1 %v3151_v62 }
  0xa8   : > { %3008 = vmatpush3.bf16.msra.mxu0 %v3151_v62 }
  0xa9   : > { %3009 = vmatprep.subr.bf16.mxu0 %v3152_v30 }
  0xaa   : > { %3033 = vmatpush3.bf16.msra.mxu1 %v3151_v62 }
  0xab   : > { %3026 = vmatprep.subr.bf16.mxu1 %v3152_v30 }
  0xac   : > { %3010 = vmatpush3.bf16.msra.mxu0 %v3152_v30 }
  0xae   : > { %3034 = vmatpush3.bf16.msra.mxu1 %v3152_v30 }
  0xaf   : > { %3012 = vmatmul.mubr.bf16.vlgmr.msra.gmra.mxu0 %v3573_v41 }
  0xb1   : > { %3016 = vmatmul.mubr.bf16.vlgmr.msra.gmra.mxu1 %v926_v2 }
  0xef   : > { %v2821_v40 = vpop.f32.mrf.mxu0 }
  0xf1   : > { %v1042_v42 = vpop.f32.mrf.mxu0  ;;  %v2845_v43 = vpop.f32.mrf.mxu1 }
  0xf2   : > { %v1164_v34 = vadd.f32 %v2845_v43, %v2821_v40 }
  0xf3   : > { %v2822_v44 = vpop.f32.mrf.mxu0  ;;  %v1155_v12 = vpop.f32.mrf.mxu1 }
  0xf4   : > { %v1156_v36 = vadd.f32 %v1155_v12, %v1042_v42 }
  0xf5   : > { %v1045_v45 = vpop.f32.mrf.mxu0  ;;  %v2846_v46 = vpop.f32.mrf.mxu1 }
  0xf6   : > { %v1167_v35 = vadd.f32 %v2846_v46, %v2822_v44 }
  0xf7   : > { %v2825_v47 = vpop.f32.mrf.mxu0  ;;  %v1158_v48 = vpop.f32.mrf.mxu1 }
  0xf8   : > { %v1159_v38 = vadd.f32 %v1158_v48, %v1045_v45 }
  0xf9   : > { %v1058_v49 = vpop.f32.mrf.mxu0  ;;  %v2849_v50 = vpop.f32.mrf.mxu1 }
  0xfa   : > { %v1180_v40 = vadd.f32 %v2849_v50, %v2825_v47 }
  0xfb   : > { %v2826_v52 = vpop.f32.mrf.mxu0  ;;  %v1171_v53 = vpop.f32.mrf.mxu1 }
  0xfc   : > { %v1172_v42 = vadd.f32 %v1171_v53, %v1058_v49 }
  0xfd   : > { %v1061_v41 = vpop.f32.mrf.mxu0  ;;  %v2850_v54 = vpop.f32.mrf.mxu1 }
  0xfe   : > { %v1183_v44 = vadd.f32 %v2850_v54, %v2826_v52 }
  0xff   : > { %v1174_v56 = vpop.f32.mrf.mxu1 }
 0x100   : > { %v1175_v45 = vadd.f32 %v1174_v56, %v1061_v41 }
 0x10f   : > { %v2869_v55 = vpop.f32.mrf.mxu0 }
 0x110   : > { %v1318_v39 = vadd.f32 %v2869_v55, %v1164_v34 }
 0x111   : > { %v1285_v57 = vpop.f32.mrf.mxu0  ;;  %v2893_v58 = vpop.f32.mrf.mxu1 }
 0x112   : > { %v1316_v62 = vadd.f32 %v1285_v57, %v1156_v36  ;;  %v1456_v46 = vadd.f32 %v2893_v58, %v1318_v39 }
 0x113   : > { %v2870_v29 = vpop.f32.mrf.mxu0  ;;  %v1423_v59 = vpop.f32.mrf.mxu1 }
 0x114   : > { %v1319_v61 = vadd.f32 %v2870_v29, %v1167_v35  ;;  %v1454_v48 = vadd.f32 %v1423_v59, %v1316_v62 }
 0x115   : > { %v1288_v28 = vpop.f32.mrf.mxu0  ;;  %v2894_v60 = vpop.f32.mrf.mxu1 }
 0x116   : > { %v1457_v12 = vadd.f32 %v2894_v60, %v1319_v61 }
 0x117   : > { %v2873_v63 = vpop.f32.mrf.mxu0  ;;  %v1426_v0 = vpop.f32.mrf.mxu1 }
 0x118   : > { %v1322_v34 = vadd.f32 %v2873_v63, %v1180_v40 }
 0x119   : > { %v1301_v26 = vpop.f32.mrf.mxu0  ;;  %v2897_v27 = vpop.f32.mrf.mxu1 }
 0x11a   : > { %v1460_v54 = vadd.f32 %v2897_v27, %v1322_v34 }
 0x11b   : > { %v2874_v1 = vpop.f32.mrf.mxu0  ;;  %v1439_v2 = vpop.f32.mrf.mxu1 }
 0x11c   : > { %v1323_v35 = vadd.f32 %v2874_v1, %v1183_v44 }
 0x11d   : > { %v1304_v3 = vpop.f32.mrf.mxu0  ;;  %v2898_v4 = vpop.f32.mrf.mxu1 }
 0x11e   : > { %v1461_v58 = vadd.f32 %v2898_v4, %v1323_v35 }
 0x11f   : > { %v1442_v6 = vpop.f32.mrf.mxu1 }
 0x12f   : > { %v2917_v5 = vpop.f32.mrf.mxu0 }
 0x130   : > { %v1594_v36 = vadd.f32 %v2917_v5, %v1456_v46 }
 0x131   : > { %v1561_v7 = vpop.f32.mrf.mxu0  ;;  %v2941_v8 = vpop.f32.mrf.mxu1 }
 0x132   : > { %v1592_v47 = vadd.f32 %v1561_v7, %v1454_v48  ;;  %v1732_v60 = vadd.f32 %v2941_v8, %v1594_v36 }
 0x133   : > { %v2918_v9 = vpop.f32.mrf.mxu0  ;;  %v1699_v10 = vpop.f32.mrf.mxu1 }
 0x134   : > { %v1595_v57 = vadd.f32 %v2918_v9, %v1457_v12  ;;  %v1730_v41 = vadd.f32 %v1699_v10, %v1592_v47 }
 0x135   : > { %v1564_v13 = vpop.f32.mrf.mxu0  ;;  %v2942_v14 = vpop.f32.mrf.mxu1 }
 0x136   : > { %v1733_v61 = vadd.f32 %v2942_v14, %v1595_v57 }
 0x137   : > { %v2921_v15 = vpop.f32.mrf.mxu0  ;;  %v1702_v11 = vpop.f32.mrf.mxu1 }
 0x138   : > { %v1598_v56 = vadd.f32 %v2921_v15, %v1460_v54 }
 0x139   : > { %v1577_v16 = vpop.f32.mrf.mxu0  ;;  %v2945_v17 = vpop.f32.mrf.mxu1 }
 0x13a   : > { %v1736_v27 = vadd.f32 %v2945_v17, %v1598_v56 }
 0x13b   : > { %v2922_v18 = vpop.f32.mrf.mxu0  ;;  %v3740_v22 = vpop.f32.mrf.mxu1 }
 0x13c   : > { %3795 = vst [vmem:[#allocation2_spill] sm:$0xff] %v3740_v22  ;;  %v1317_v22 = vadd.f32 %v1288_v28, %v1159_v38  ;;  %v1320_v28 = vadd.f32 %v1301_v26, %v1172_v42  ;;  %v1321_v38 = vadd.f32 %v1304_v3, %v1175_v45 }
 0x13d   : > { %v1580_v19 = vpop.f32.mrf.mxu0  ;;  %v2946_v20 = vpop.f32.mrf.mxu1 }
 0x13e   : > { %v1455_v29 = vadd.f32 %v1426_v0, %v1317_v22  ;;  %v1458_v49 = vadd.f32 %v1439_v2, %v1320_v28  ;;  %v1459_v53 = vadd.f32 %v1442_v6, %v1321_v38  ;;  %v1599_v0 = vadd.f32 %v2922_v18, %v1461_v58 }
 0x13f   : > { %v1718_v51 = vpop.f32.mrf.mxu1 }
 0x140   : > { %v1593_v52 = vadd.f32 %v1564_v13, %v1455_v29  ;;  %v1596_v9 = vadd.f32 %v1577_v16, %v1458_v49  ;;  %v1597_v26 = vadd.f32 %v1580_v19, %v1459_v53  ;;  %v1737_v4 = vadd.f32 %v2946_v20, %v1599_v0 }
 0x142   : > { %v1731_v63 = vadd.f32 %v1702_v11, %v1593_v52  ;;  %v1735_v14 = vadd.f32 %v1718_v51, %v1597_v26 }
 0x143   : > { %v3796_v6 = vld [vmem:[#allocation2_spill] sm:$0xff] }
 0x144   : > { %v1734_v10 = vadd.f32 %v3796_v6, %v1596_v9 }
 0x14f   : > { %v2965_v21 = vpop.f32.mrf.mxu0 }
 0x150   : > { %v1870_v1 = vadd.f32 %v2965_v21, %v1732_v60 }
 0x151   : > { %v1837_v23 = vpop.f32.mrf.mxu0  ;;  %v2989_v24 = vpop.f32.mrf.mxu1 }
 0x152   : > { %v1868_v3 = vadd.f32 %v1837_v23, %v1730_v41  ;;  %v2008_v8 = vadd.f32 %v2989_v24, %v1870_v1 }
 0x153   : > { %v2966_v25 = vpop.f32.mrf.mxu0  ;;  %v1975_v31 = vpop.f32.mrf.mxu1 }
 0x154   : > { %v1871_v5 = vadd.f32 %v2966_v25, %v1733_v61  ;;  %v2006_v15 = vadd.f32 %v1975_v31, %v1868_v3 }
 0x155   : > { %v1840_v32 = vpop.f32.mrf.mxu0  ;;  %v2990_v33 = vpop.f32.mrf.mxu1 }
 0x156   : > { %v1869_v13 = vadd.f32 %v1840_v32, %v1731_v63  ;;  %v2009_v2 = vadd.f32 %v2990_v33, %v1871_v5 }
 0x157   : > { %v2969_v37 = vpop.f32.mrf.mxu0  ;;  %v1978_v30 = vpop.f32.mrf.mxu1 }
 0x158   : > { %v1874_v11 = vadd.f32 %v2969_v37, %v1736_v27  ;;  %v2007_v25 = vadd.f32 %v1978_v30, %v1869_v13 }
 0x159   : > { %v1853_v43 = vpop.f32.mrf.mxu0  ;;  %v2993_v55 = vpop.f32.mrf.mxu1 }
 0x15a   : > { %v1872_v40 = vadd.f32 %v1853_v43, %v1734_v10  ;;  %v2012_v33 = vadd.f32 %v2993_v55, %v1874_v11 }
 0x15b   : > { %v2970_v50 = vpop.f32.mrf.mxu0  ;;  %v1991_v39 = vpop.f32.mrf.mxu1 }
 0x15c   : > { %v1875_v16 = vadd.f32 %v2970_v50, %v1737_v4  ;;  %v2010_v43 = vadd.f32 %v1991_v39, %v1872_v40 }
 0x15d   : > { %v1856_v59 = vpop.f32.mrf.mxu0  ;;  %v2994_v7 = vpop.f32.mrf.mxu1 }
 0x15e   : > { %v1873_v20 = vadd.f32 %v1856_v59, %v1735_v14  ;;  %v2013_v37 = vadd.f32 %v2994_v7, %v1875_v16 }
 0x15f   : > { %v1994_v18 = vpop.f32.mrf.mxu1 }
 0x160   : > { %v2011_v48 = vadd.f32 %v1994_v18, %v1873_v20 }
 0x16f   : > { %v3013_v22 = vpop.f32.mrf.mxu0 }
 0x170   : > { %v2146_v19 = vadd.f32 %v3013_v22, %v2008_v8 }
 0x171   : > { %v2113_v62 = vpop.f32.mrf.mxu0  ;;  %v3017_v44 = vpop.f32.mrf.mxu1 }
 0x172   : > { %v2144_v32 = vadd.f32 %v2113_v62, %v2006_v15  ;;  %v2150_v34 = vadd.f32 %v3017_v44, %v2012_v33  ;;  %v2207_v36 = vmul.f32 %v2146_v19, %v2146_v19 }
 0x173   : > { %v3014_v21 = vpop.f32.mrf.mxu0  ;;  %v2129_v31 = vpop.f32.mrf.mxu1 }
 0x174   : > { %v2147_v23 = vadd.f32 %v3014_v21, %v2009_v2  ;;  %v2205_v12 = vmul.f32 %v2144_v32, %v2144_v32  ;;  %v2148_v57 = vadd.f32 %v2129_v31, %v2010_v43  ;;  %v2211_v59 = vmul.f32 %v2150_v34, %v2150_v34 }
 0x175   : > { %v2116_v17 = vpop.f32.mrf.mxu0  ;;  %v3018_v42 = vpop.f32.mrf.mxu1 }
 0x176   : > { %v2680_v51 = vpack.c.bf16 %v2147_v23, %v2146_v19  ;;  %v2145_v24 = vadd.f32 %v2116_v17, %v2007_v25  ;;  %v2151_v29 = vadd.f32 %v3018_v42, %v2013_v37  ;;  %v2208_v52 = vmul.f32 %v2147_v23, %v2147_v23 }
 0x177   : > { %v2132_v38 = vpop.f32.mrf.mxu1  ;;  %v2209_v60 = vmul.f32 %v2148_v57, %v2148_v57 }
 0x178   : > { %2692 = vst [vmem:[%s3747_s18 + $0x8] sm:$0xff] %v2680_v51   ;;  %v2675_v30 = vpack.c.bf16 %v2145_v24, %v2144_v32  ;;  %v2192_v46 = vadd.f32 %v2145_v24, %v2144_v32  ;;  %v2206_v45 = vmul.f32 %v2145_v24, %v2145_v24  ;;  %v2690_v55 = vpack.c.bf16 %v2151_v29, %v2150_v34 }
 0x179   : > { %v2149_v47 = vadd.f32 %v2132_v38, %v2011_v48  ;;  %v2212_v1 = vmul.f32 %v2151_v29, %v2151_v29 }
 0x17a   : > { %2676 = vst [vmem:[%s3747_s18] sm:$0xff] %v2675_v30   ;;  %v2193_v35 = vadd.f32 %v2192_v46, %v2146_v19  ;;  %v2213_v28 = vadd.f32 %v2206_v45, %v2205_v12  ;;  %2694 = vst [vmem:[%s3747_s18 + $0x18] sm:$0xff] %v2690_v55  }
 0x17b   : > { %v2685_v39 = vpack.c.bf16 %v2149_v47, %v2148_v57  ;;  %v2210_v53 = vmul.f32 %v2149_v47, %v2149_v47 }
 0x17c   : > { %v2194_v50 = vadd.f32 %v2193_v35, %v2147_v23  ;;  %v2214_v54 = vadd.f32 %v2213_v28, %v2207_v36 }
 0x17d   : > { %2693 = vst [vmem:[%s3747_s18 + $0x10] sm:$0xff] %v2685_v39  }
 0x17e   : > { %v2195_v58 = vadd.f32 %v2194_v50, %v2148_v57  ;;  %v2215_v61 = vadd.f32 %v2214_v54, %v2208_v52 }
 0x180   : > { %v2196_v49 = vadd.f32 %v2195_v58, %v2149_v47  ;;  %v2216_v41 = vadd.f32 %v2215_v61, %v2209_v60 }
 0x182   : > { %v2197_v56 = vadd.f32 %v2196_v49, %v2150_v34  ;;  %v2217_v63 = vadd.f32 %v2216_v41, %v2210_v53 }
 0x184   : > { %v2198_v0 = vadd.f32 %v2197_v56, %v2151_v29  ;;  %v2218_v5 = vadd.f32 %v2217_v63, %v2211_v59 }
 0x186   : > { %v2199_v9 = vrot.slane %v2198_v0, 4  ;;  %v2219_v26 = vadd.f32 %v2218_v5, %v2212_v1 }
 0x188   : > { %v2200_v3 = vadd.f32 %v2199_v9, %v2198_v0  ;;  %v2220_v7 = vrot.slane %v2219_v26, 4 }
 0x18a   : > { %v2201_v22 = vrot.slane %v2200_v3, 2  ;;  %v2221_v13 = vadd.f32 %v2220_v7, %v2219_v26 }
 0x18c   : > { %v2202_v27 = vadd.f32 %v2201_v22, %v2200_v3  ;;  %v2222_v62 = vrot.slane %v2221_v13, 2 }
 0x18e   : > { %v2203_v4 = vrot.slane %v2202_v27, 1  ;;  %v2223_v8 = vadd.f32 %v2222_v62, %v2221_v13 }
 0x190   : > { %v2224_v2 = vrot.slane %v2223_v8, 1  ;;  %v2204_v6 = vadd.f32 %v2203_v4, %v2202_v27 }
 0x192   : > { %v2225_v10 = vadd.f32 %v2224_v2, %v2223_v8 }
 0x194   : > { %v2227_v14 = vsel %vm867_vm11, %v2204_v6, %v2225_v10 }
 0x195   : > { %2228 = vst [vmem:[%s412_s11] sm:$0x3] %v2227_v14 }
 0x196 PF: > { %s16_s22 = sadd.s32 1, %s3191_s22   ;;  %s3797_s18 = smov %s3183_s20 }
 0x197   : > { %p13_p13 = scmp.ge.s32.totalorder %s16_s22, 10   ;;  %s3798_s19 = smov %s3187_s21 }
 0x198   : > { %s3799_s20 = smov %s3802_s23  ;;  %s3800_s21 = smov %s3806_s24 }
 0x199   :  { %15 = sbr.rel (!%p13_p13) target bundleno = 3 (0x3), region = 92 }

</bundles_post_ra>
